<compile_context>
chip_gen: v5e
topology: v5e:2x2
jax: 0.10.0
libtpu: 0.0.40
codegen_flags: <defaults>
</compile_context>

<pallas_src>
import jax
import jax.numpy as jnp
from jax.experimental import pallas as pl
from jax.experimental.pallas import tpu as pltpu

IN_DIM = 28 * 28          # 784
H1 = 256
H2 = 64
PAD_H2 = 128              # latent padded to one full lane group (64 -> 128)


def _round_up(n, m):
    return (n + m - 1) // m * m


def _autoencoder_kernel(x_ref,
                        w1_ref, b1_ref,
                        w2_ref, b2_ref,
                        w3_ref, b3_ref,
                        w4_ref, b4_ref,
                        o_ref):
    # Input tile is f32 straight from HBM; cast to bf16 in-kernel (no wrapper
    # pad/cast pass needed).
    x = x_ref[...].astype(jnp.bfloat16)                              # (TILE_B, 784)

    # encoder
    h = jnp.dot(x, w1_ref[...], preferred_element_type=jnp.float32) + b1_ref[...]
    h = jnp.maximum(h, 0.0).astype(jnp.bfloat16)                     # ReLU
    h = jnp.dot(h, w2_ref[...], preferred_element_type=jnp.float32) + b2_ref[...]
    h = jnp.maximum(h, 0.0).astype(jnp.bfloat16)                     # ReLU (latent, 128 lanes)

    # decoder
    h = jnp.dot(h, w3_ref[...], preferred_element_type=jnp.float32) + b3_ref[...]
    h = jnp.maximum(h, 0.0).astype(jnp.bfloat16)                     # ReLU
    h = jnp.dot(h, w4_ref[...], preferred_element_type=jnp.float32) + b4_ref[...]
    # sigmoid(h) == 0.5*(tanh(0.5*h)+1): single EUP op per element; only the
    # 784 real columns exist here (no padded work, no padded stores).
    o_ref[...] = (0.5 * (jnp.tanh(0.5 * h) + 1.0)).astype(o_ref.dtype)


def init_params(key):
    """Deterministic init matching nn.Linear's U(-1/sqrt(fan_in), 1/sqrt(fan_in)).

    Weights are stored transposed relative to PyTorch: (in, out), f32.
    Biases are (1, out) so they broadcast over the batch (sublane) axis.
    """
    dims = [(IN_DIM, H1), (H1, H2), (H2, H1), (H1, IN_DIM)]
    params = {}
    keys = jax.random.split(key, 2 * len(dims))
    for i, (fan_in, fan_out) in enumerate(dims):
        bound = 1.0 / jnp.sqrt(jnp.float32(fan_in))
        w = jax.random.uniform(keys[2 * i], (fan_in, fan_out),
                               minval=-bound, maxval=bound, dtype=jnp.float32)
        b = jax.random.uniform(keys[2 * i + 1], (1, fan_out),
                               minval=-bound, maxval=bound, dtype=jnp.float32)
        params[f"w{i + 1}"] = w
        params[f"b{i + 1}"] = b
    return params


def prepare_params(params):
    """Pad only the latent dim to 128 lanes; cast weights to bf16 (once)."""
    def pad_to(a, shape):
        return jnp.pad(a, [(0, t - s) for s, t in zip(a.shape, shape)])

    return {
        "w1": params["w1"].astype(jnp.bfloat16),                        # (784, 256)
        "b1": params["b1"].astype(jnp.float32),                         # (1, 256)
        "w2": pad_to(params["w2"], (H1, PAD_H2)).astype(jnp.bfloat16),  # (256, 128), zero cols
        "b2": pad_to(params["b2"], (1, PAD_H2)).astype(jnp.float32),    # (1, 128)
        "w3": pad_to(params["w3"], (PAD_H2, H1)).astype(jnp.bfloat16),  # (128, 256), zero rows
        "b3": params["b3"].astype(jnp.float32),                         # (1, 256)
        "w4": params["w4"].astype(jnp.bfloat16),                        # (256, 784)
        "b4": params["b4"].astype(jnp.float32),                         # (1, 784)
    }


def linear_autoencoder(x, padded_params, *, tile_b=None):
    """x: (B, 784) float32. padded_params: output of prepare_params()."""
    B = x.shape[0]
    if tile_b is None:
        if B >= 1024:
            # Mem-bound: big tiles amortize per-step overhead; 512 keeps the
            # double-buffered f32 in/out tiles + resident weights well under
            # VMEM limits on every generation (incl. v5e's 16 MiB default).
            tile_b = 512
        elif B >= 32:
            # >=2 grid steps so v7x's two TensorCores both get work.
            tile_b = _round_up(pl.cdiv(B, 2), 16)
        else:
            tile_b = _round_up(max(B, 1), 16)
    tile_b = _round_up(tile_b, 16)          # bf16 packs 2 rows / sublane
    Bp = _round_up(max(B, tile_b), tile_b)

    # Only pad batch rows (cheap) when B doesn't divide the tile; features are
    # fed unpadded (784 == full last dim, so the BlockSpec is legal).
    xp = x if Bp == B else jnp.pad(x, ((0, Bp - B), (0, 0)))

    p = padded_params
    grid = (Bp // tile_b,)

    flops = 2 * Bp * (IN_DIM * H1 + H1 * PAD_H2 + PAD_H2 * H1 + H1 * IN_DIM)
    bytes_accessed = (Bp * IN_DIM * 4                                # x read (f32)
                      + Bp * IN_DIM * 4                              # out write (f32)
                      + sum(int(v.size) * v.dtype.itemsize for v in p.values()))
    cost = pl.CostEstimate(flops=flops,
                           transcendentals=Bp * IN_DIM,
                           bytes_accessed=bytes_accessed)

    def resident(a):  # whole array, block index never changes -> stays in VMEM
        return pl.BlockSpec(a.shape, lambda i: (0, 0))

    out = pl.pallas_call(
        _autoencoder_kernel,
        out_shape=jax.ShapeDtypeStruct((Bp, IN_DIM), jnp.float32),
        grid=grid,
        in_specs=[
            pl.BlockSpec((tile_b, IN_DIM), lambda i: (i, 0)),        # x tile (f32)
            resident(p["w1"]), resident(p["b1"]),
            resident(p["w2"]), resident(p["b2"]),
            resident(p["w3"]), resident(p["b3"]),
            resident(p["w4"]), resident(p["b4"]),
        ],
        out_specs=pl.BlockSpec((tile_b, IN_DIM), lambda i: (i, 0)),
        compiler_params=pltpu.CompilerParams(
            dimension_semantics=("parallel",),
            vmem_limit_bytes=32 * 1024 * 1024),
        cost_estimate=cost,
    )(xp,
      p["w1"], p["b1"], p["w2"], p["b2"],
      p["w3"], p["b3"], p["w4"], p["b4"])

    return out if Bp == B else out[:B]


def _reference(x, params):
    """Pure-JAX reference with the same bf16-operand / f32-accumulate math."""
    def dot(a, w):
        return jnp.dot(a.astype(jnp.bfloat16), w.astype(jnp.bfloat16),
                       preferred_element_type=jnp.float32)
    h = jnp.maximum(dot(x, params["w1"]) + params["b1"], 0.0)
    h = jnp.maximum(dot(h, params["w2"]) + params["b2"], 0.0)
    h = jnp.maximum(dot(h, params["w3"]) + params["b3"], 0.0)
    return jax.nn.sigmoid(dot(h, params["w4"]) + params["b4"])


if __name__ == "__main__":
    key = jax.random.PRNGKey(0)
    pkey, xkey = jax.random.split(key)
    params = init_params(pkey)
    padded_params = prepare_params(params)

    B = 8
    x = jax.random.uniform(xkey, (B, IN_DIM), dtype=jnp.float32)  # "image" in [0,1)

    out = linear_autoencoder(x, padded_params)
    out = jax.block_until_ready(out)

    ref = _reference(x, params)
    assert out.shape == (B, IN_DIM)
    assert jnp.allclose(out, ref, atol=2e-3, rtol=2e-3), "mismatch vs JAX reference"

    print("KERNEL_OK")
</pallas_src>

<mosaic_0001>
module attributes {stable_mosaic.version = 11 : i64} {
  func.func @_autoencoder_kernel(%arg0: i32, %arg1: memref<16x784xf32, #tpu.memory_space<vmem>>, %arg2: memref<784x256xbf16, #tpu.memory_space<vmem>>, %arg3: memref<1x256xf32, #tpu.memory_space<vmem>>, %arg4: memref<256x128xbf16, #tpu.memory_space<vmem>>, %arg5: memref<1x128xf32, #tpu.memory_space<vmem>>, %arg6: memref<128x256xbf16, #tpu.memory_space<vmem>>, %arg7: memref<1x256xf32, #tpu.memory_space<vmem>>, %arg8: memref<256x784xbf16, #tpu.memory_space<vmem>>, %arg9: memref<1x784xf32, #tpu.memory_space<vmem>>, %arg10: memref<16x784xf32, #tpu.memory_space<vmem>>) attributes {dimension_semantics = [#tpu.dimension_semantics<parallel>], iteration_bounds = array<i64: 1>, scalar_prefetch = 0 : i64, scratch_operands = 0 : i64, tpu.core_type = #tpu.core_type<tc>, window_params = [{transform_indices = @transform_0, window_bounds = array<i64: 16, 784>}, {pipeline_mode = #tpu.pipeline_mode<synchronous>, transform_indices = @transform_1, window_bounds = array<i64: 784, 256>}, {pipeline_mode = #tpu.pipeline_mode<synchronous>, transform_indices = @transform_2, window_bounds = array<i64: 1, 256>}, {pipeline_mode = #tpu.pipeline_mode<synchronous>, transform_indices = @transform_3, window_bounds = array<i64: 256, 128>}, {pipeline_mode = #tpu.pipeline_mode<synchronous>, transform_indices = @transform_4, window_bounds = array<i64: 1, 128>}, {pipeline_mode = #tpu.pipeline_mode<synchronous>, transform_indices = @transform_5, window_bounds = array<i64: 128, 256>}, {pipeline_mode = #tpu.pipeline_mode<synchronous>, transform_indices = @transform_6, window_bounds = array<i64: 1, 256>}, {pipeline_mode = #tpu.pipeline_mode<synchronous>, transform_indices = @transform_7, window_bounds = array<i64: 256, 784>}, {pipeline_mode = #tpu.pipeline_mode<synchronous>, transform_indices = @transform_8, window_bounds = array<i64: 1, 784>}, {transform_indices = @transform_9, window_bounds = array<i64: 16, 784>}]} {
    %c0 = arith.constant 0 : index
    %c0_0 = arith.constant 0 : index
    %0 = vector.load %arg1[%c0, %c0_0] : memref<16x784xf32, #tpu.memory_space<vmem>>, vector<16x784xf32>
    %1 = arith.truncf %0 : vector<16x784xf32> to vector<16x784xbf16>
    %c0_1 = arith.constant 0 : index
    %c0_2 = arith.constant 0 : index
    %2 = vector.load %arg2[%c0_1, %c0_2] : memref<784x256xbf16, #tpu.memory_space<vmem>>, vector<784x256xbf16>
    %cst = arith.constant dense<0.000000e+00> : vector<16x256xf32>
    %3 = tpu.matmul %1, %2, %cst {dimension_numbers = #tpu.dot_dimension_numbers<[1], [0], [0], [1], [0, 0, 1, 1], [], []>} : vector<16x784xbf16>, vector<784x256xbf16>, vector<16x256xf32> -> vector<16x256xf32>
    %c0_3 = arith.constant 0 : index
    %c0_4 = arith.constant 0 : index
    %4 = vector.load %arg3[%c0_3, %c0_4] : memref<1x256xf32, #tpu.memory_space<vmem>>, vector<1x256xf32>
    %5 = vector.broadcast %4 : vector<1x256xf32> to vector<16x256xf32>
    %6 = arith.addf %3, %5 : vector<16x256xf32>
    %cst_5 = arith.constant 0.000000e+00 : f32
    %7 = vector.broadcast %cst_5 : f32 to vector<16x256xf32>
    %8 = arith.maximumf %6, %7 : vector<16x256xf32>
    %9 = arith.truncf %8 : vector<16x256xf32> to vector<16x256xbf16>
    %c0_6 = arith.constant 0 : index
    %c0_7 = arith.constant 0 : index
    %10 = vector.load %arg4[%c0_6, %c0_7] : memref<256x128xbf16, #tpu.memory_space<vmem>>, vector<256x128xbf16>
    %cst_8 = arith.constant dense<0.000000e+00> : vector<16x128xf32>
    %11 = tpu.matmul %9, %10, %cst_8 {dimension_numbers = #tpu.dot_dimension_numbers<[1], [0], [0], [1], [0, 0, 1, 1], [], []>} : vector<16x256xbf16>, vector<256x128xbf16>, vector<16x128xf32> -> vector<16x128xf32>
    %c0_9 = arith.constant 0 : index
    %c0_10 = arith.constant 0 : index
    %12 = vector.load %arg5[%c0_9, %c0_10] : memref<1x128xf32, #tpu.memory_space<vmem>>, vector<1x128xf32>
    %13 = vector.broadcast %12 : vector<1x128xf32> to vector<16x128xf32>
    %14 = arith.addf %11, %13 : vector<16x128xf32>
    %cst_11 = arith.constant 0.000000e+00 : f32
    %15 = vector.broadcast %cst_11 : f32 to vector<16x128xf32>
    %16 = arith.maximumf %14, %15 : vector<16x128xf32>
    %17 = arith.truncf %16 : vector<16x128xf32> to vector<16x128xbf16>
    %c0_12 = arith.constant 0 : index
    %c0_13 = arith.constant 0 : index
    %18 = vector.load %arg6[%c0_12, %c0_13] : memref<128x256xbf16, #tpu.memory_space<vmem>>, vector<128x256xbf16>
    %cst_14 = arith.constant dense<0.000000e+00> : vector<16x256xf32>
    %19 = tpu.matmul %17, %18, %cst_14 {dimension_numbers = #tpu.dot_dimension_numbers<[1], [0], [0], [1], [0, 0, 1, 1], [], []>} : vector<16x128xbf16>, vector<128x256xbf16>, vector<16x256xf32> -> vector<16x256xf32>
    %c0_15 = arith.constant 0 : index
    %c0_16 = arith.constant 0 : index
    %20 = vector.load %arg7[%c0_15, %c0_16] : memref<1x256xf32, #tpu.memory_space<vmem>>, vector<1x256xf32>
    %21 = vector.broadcast %20 : vector<1x256xf32> to vector<16x256xf32>
    %22 = arith.addf %19, %21 : vector<16x256xf32>
    %cst_17 = arith.constant 0.000000e+00 : f32
    %23 = vector.broadcast %cst_17 : f32 to vector<16x256xf32>
    %24 = arith.maximumf %22, %23 : vector<16x256xf32>
    %25 = arith.truncf %24 : vector<16x256xf32> to vector<16x256xbf16>
    %c0_18 = arith.constant 0 : index
    %c0_19 = arith.constant 0 : index
    %26 = vector.load %arg8[%c0_18, %c0_19] : memref<256x784xbf16, #tpu.memory_space<vmem>>, vector<256x784xbf16>
    %cst_20 = arith.constant dense<0.000000e+00> : vector<16x784xf32>
    %27 = tpu.matmul %25, %26, %cst_20 {dimension_numbers = #tpu.dot_dimension_numbers<[1], [0], [0], [1], [0, 0, 1, 1], [], []>} : vector<16x256xbf16>, vector<256x784xbf16>, vector<16x784xf32> -> vector<16x784xf32>
    %c0_21 = arith.constant 0 : index
    %c0_22 = arith.constant 0 : index
    %28 = vector.load %arg9[%c0_21, %c0_22] : memref<1x784xf32, #tpu.memory_space<vmem>>, vector<1x784xf32>
    %29 = vector.broadcast %28 : vector<1x784xf32> to vector<16x784xf32>
    %30 = arith.addf %27, %29 : vector<16x784xf32>
    %cst_23 = arith.constant 5.000000e-01 : f32
    %31 = vector.broadcast %cst_23 : f32 to vector<16x784xf32>
    %32 = arith.mulf %31, %30 : vector<16x784xf32>
    %33 = math.tanh %32 : vector<16x784xf32>
    %cst_24 = arith.constant 1.000000e+00 : f32
    %34 = vector.broadcast %cst_24 : f32 to vector<16x784xf32>
    %35 = arith.addf %33, %34 : vector<16x784xf32>
    %cst_25 = arith.constant 5.000000e-01 : f32
    %36 = vector.broadcast %cst_25 : f32 to vector<16x784xf32>
    %37 = arith.mulf %36, %35 : vector<16x784xf32>
    %c0_26 = arith.constant 0 : index
    %c0_27 = arith.constant 0 : index
    %38 = vector.load %arg10[%c0_26, %c0_27] : memref<16x784xf32, #tpu.memory_space<vmem>>, vector<16x784xf32>
    tpu.vector_store %arg10[%c0_26, %c0_27], %37 {strides = array<i32>} : memref<16x784xf32, #tpu.memory_space<vmem>>, vector<16x784xf32>,
    return
  }
  func.func @transform_0(%arg0: i32) -> (i32, i32) {
    %c0_i32 = arith.constant 0 : i32
    %c0_i32_0 = arith.constant 0 : i32
    return %arg0, %c0_i32 : i32, i32
  }
  func.func @transform_1(%arg0: i32) -> (i32, i32) {
    %c0_i32 = arith.constant 0 : i32
    %c0_i32_0 = arith.constant 0 : i32
    %c0_i32_1 = arith.constant 0 : i32
    return %c0_i32, %c0_i32_0 : i32, i32
  }
  func.func @transform_2(%arg0: i32) -> (i32, i32) {
    %c0_i32 = arith.constant 0 : i32
    %c0_i32_0 = arith.constant 0 : i32
    %c0_i32_1 = arith.constant 0 : i32
    return %c0_i32, %c0_i32_0 : i32, i32
  }
  func.func @transform_3(%arg0: i32) -> (i32, i32) {
    %c0_i32 = arith.constant 0 : i32
    %c0_i32_0 = arith.constant 0 : i32
    %c0_i32_1 = arith.constant 0 : i32
    return %c0_i32, %c0_i32_0 : i32, i32
  }
  func.func @transform_4(%arg0: i32) -> (i32, i32) {
    %c0_i32 = arith.constant 0 : i32
    %c0_i32_0 = arith.constant 0 : i32
    %c0_i32_1 = arith.constant 0 : i32
    return %c0_i32, %c0_i32_0 : i32, i32
  }
  func.func @transform_5(%arg0: i32) -> (i32, i32) {
    %c0_i32 = arith.constant 0 : i32
    %c0_i32_0 = arith.constant 0 : i32
    %c0_i32_1 = arith.constant 0 : i32
    return %c0_i32, %c0_i32_0 : i32, i32
  }
  func.func @transform_6(%arg0: i32) -> (i32, i32) {
    %c0_i32 = arith.constant 0 : i32
    %c0_i32_0 = arith.constant 0 : i32
    %c0_i32_1 = arith.constant 0 : i32
    return %c0_i32, %c0_i32_0 : i32, i32
  }
  func.func @transform_7(%arg0: i32) -> (i32, i32) {
    %c0_i32 = arith.constant 0 : i32
    %c0_i32_0 = arith.constant 0 : i32
    %c0_i32_1 = arith.constant 0 : i32
    return %c0_i32, %c0_i32_0 : i32, i32
  }
  func.func @transform_8(%arg0: i32) -> (i32, i32) {
    %c0_i32 = arith.constant 0 : i32
    %c0_i32_0 = arith.constant 0 : i32
    %c0_i32_1 = arith.constant 0 : i32
    return %c0_i32, %c0_i32_0 : i32, i32
  }
  func.func @transform_9(%arg0: i32) -> (i32, i32) {
    %c0_i32 = arith.constant 0 : i32
    %c0_i32_0 = arith.constant 0 : i32
    return %arg0, %c0_i32 : i32, i32
  }
}

</mosaic_0001>

<bundles_post_ra>
// kernel: tpu_custom_call.1
= control target key start
LH: loop header
LB: loop body
LE: loop exit
PB: predicated region body
PF: predicated region fallthrough
CT: control target
= control target key end

     0   :  { %vm649_vm0 = vcmask 130048   ;;  %s5001_s0 = inlined_call_operand.vmem [shape: f32[16,784], index: 0, kind: input, shape index: {}]   ;;  %s5002_s1 = inlined_call_operand.vmem [shape: bf16[784,256], index: 1, kind: input, shape index: {}]   ;;  %s5003_s2 = inlined_call_operand.vmem [shape: f32[1,256], index: 2, kind: input, shape index: {}]   ;;  %s5004_s3 = inlined_call_operand.vmem [shape: bf16[256,128], index: 3, kind: input, shape index: {}]   ;;  %s5005_s4 = inlined_call_operand.vmem [shape: f32[1,128], index: 4, kind: input, shape index: {}]   ;;  %s5006_s5 = inlined_call_operand.vmem [shape: bf16[128,256], index: 5, kind: input, shape index: {}]   ;;  %s5007_s6 = inlined_call_operand.vmem [shape: f32[1,256], index: 6, kind: input, shape index: {}]   ;;  %s5008_s7 = inlined_call_operand.vmem [shape: bf16[256,784], index: 7, kind: input, shape index: {}]   ;;  %s5009_s8 = inlined_call_operand.vmem [shape: f32[1,784], index: 8, kind: input, shape index: {}]   ;;  %s5010_s9 = inlined_call_operand.hbm [shape: f32[16,784], index: 9, kind: output, shape index: {}]  }
   0x1   :  { %v2216_v0 = vld [vmem:[%s5002_s1 + $0x70] sm:$0xf]  ;;  %v3143_v1 = vld [vmem:[%s5002_s1 + $0x74] sm:$0xf0]  ;;  %v2208_v11 = vld [vmem:[%s5002_s1 + $0x60] sm:$0xf] }
   0x2   :  { %v2344_v2 = vld [vmem:[%s5002_s1 + $0x170] sm:$0xf]  ;;  %v2217_v3 = vor.u32 %v3143_v1, %v2216_v0  ;;  %v3175_v4 = vld [vmem:[%s5002_s1 + $0x174] sm:$0xf0]  ;;  %v3141_v13 = vld [vmem:[%s5002_s1 + $0x64] sm:$0xf0] }
   0x3   :  { %v2408_v5 = vld [vmem:[%s5002_s1 + $0x1f0] sm:$0xf]  ;;  %v3191_v6 = vld [vmem:[%s5002_s1 + $0x1f4] sm:$0xf0]  ;;  %v2345_v7 = vor.u32 %v3175_v4, %v2344_v2  ;;  %v2336_v14 = vld [vmem:[%s5002_s1 + $0x160] sm:$0xf]  ;;  %v2209_v16 = vor.u32 %v3141_v13, %v2208_v11 }
   0x4   :  { %v2409_v8 = vor.u32 %v3191_v6, %v2408_v5  ;;  %v2280_v9 = vld [vmem:[%s5002_s1 + $0xf0] sm:$0xf]  ;;  %v3159_v10 = vld [vmem:[%s5002_s1 + $0xf4] sm:$0xf0]  ;;  %653 = vmatpush.bf16.msra.mxu0 %v2217_v3  ;;  %v3173_v15 = vld [vmem:[%s5002_s1 + $0x164] sm:$0xf0] }
   0x5   :  { %v2281_v12 = vor.u32 %v3159_v10, %v2280_v9  ;;  %681 = vmatpush.bf16.msra.mxu2 %v2345_v7  ;;  %v2337_v17 = vor.u32 %v3173_v15, %v2336_v14  ;;  %v2400_v18 = vld [vmem:[%s5002_s1 + $0x1e0] sm:$0xf]  ;;  %v3189_v19 = vld [vmem:[%s5002_s1 + $0x1e4] sm:$0xf0]  ;;  %v2200_v23 = vld [vmem:[%s5002_s1 + $0x50] sm:$0xf] }
   0x6   :  { %695 = vmatpush.bf16.msra.mxu3 %v2409_v8  ;;  %v2272_v20 = vld [vmem:[%s5002_s1 + $0xe0] sm:$0xf]  ;;  %v2401_v21 = vor.u32 %v3189_v19, %v2400_v18  ;;  %v3157_v22 = vld [vmem:[%s5002_s1 + $0xe4] sm:$0xf0]  ;;  %v3139_v24 = vld [vmem:[%s5002_s1 + $0x54] sm:$0xf0] }
   0x7   :  { %667 = vmatpush.bf16.msra.mxu1 %v2281_v12  ;;  %v2273_v25 = vor.u32 %v3157_v22, %v2272_v20  ;;  %v2328_v26 = vld [vmem:[%s5002_s1 + $0x150] sm:$0xf]  ;;  %v3171_v27 = vld [vmem:[%s5002_s1 + $0x154] sm:$0xf0]  ;;  %v2201_v29 = vor.u32 %v3139_v24, %v2200_v23  ;;  %v2192_v35 = vld [vmem:[%s5002_s1 + $0x40] sm:$0xf] }
   0x8   :  { %v2392_v28 = vld [vmem:[%s5002_s1 + $0x1d0] sm:$0xf]  ;;  %654 = vmatpush.bf16.msra.mxu0 %v2209_v16  ;;  %v3187_v30 = vld [vmem:[%s5002_s1 + $0x1d4] sm:$0xf0]  ;;  %v2329_v33 = vor.u32 %v3171_v27, %v2328_v26  ;;  %v3137_v36 = vld [vmem:[%s5002_s1 + $0x44] sm:$0xf0] }
   0x9   :  { %v2264_v31 = vld [vmem:[%s5002_s1 + $0xd0] sm:$0xf]  ;;  %v3155_v32 = vld [vmem:[%s5002_s1 + $0xd4] sm:$0xf0]  ;;  %682 = vmatpush.bf16.msra.mxu2 %v2337_v17  ;;  %v2393_v34 = vor.u32 %v3187_v30, %v2392_v28  ;;  %v2320_v37 = vld [vmem:[%s5002_s1 + $0x140] sm:$0xf]  ;;  %v2193_v44 = vor.u32 %v3137_v36, %v2192_v35 }
   0xa   :  { %696 = vmatpush.bf16.msra.mxu3 %v2401_v21  ;;  %v2265_v38 = vor.u32 %v3155_v32, %v2264_v31  ;;  %v3169_v39 = vld [vmem:[%s5002_s1 + $0x144] sm:$0xf0]  ;;  %v2384_v40 = vld [vmem:[%s5002_s1 + $0x1c0] sm:$0xf]  ;;  %v2184_v47 = vld [vmem:[%s5002_s1 + $0x30] sm:$0xf] }
   0xb   :  { %668 = vmatpush.bf16.msra.mxu1 %v2273_v25  ;;  %v3185_v41 = vld [vmem:[%s5002_s1 + $0x1c4] sm:$0xf0]  ;;  %v2256_v42 = vld [vmem:[%s5002_s1 + $0xc0] sm:$0xf]  ;;  %v2321_v45 = vor.u32 %v3169_v39, %v2320_v37  ;;  %v3135_v48 = vld [vmem:[%s5002_s1 + $0x34] sm:$0xf0] }
   0xc   :  { %v3153_v43 = vld [vmem:[%s5002_s1 + $0xc4] sm:$0xf0]  ;;  %655 = vmatpush.bf16.msra.mxu0 %v2201_v29  ;;  %v2385_v46 = vor.u32 %v3185_v41, %v2384_v40  ;;  %v2312_v49 = vld [vmem:[%s5002_s1 + $0x130] sm:$0xf]  ;;  %v3167_v51 = vld [vmem:[%s5002_s1 + $0x134] sm:$0xf0]  ;;  %v2185_v56 = vor.u32 %v3135_v48, %v2184_v47 }
   0xd   :  { %683 = vmatpush.bf16.msra.mxu2 %v2329_v33  ;;  %v2257_v50 = vor.u32 %v3153_v43, %v2256_v42  ;;  %v2376_v52 = vld [vmem:[%s5002_s1 + $0x1b0] sm:$0xf]  ;;  %v3183_v53 = vld [vmem:[%s5002_s1 + $0x1b4] sm:$0xf0]  ;;  %v2313_v57 = vor.u32 %v3167_v51, %v2312_v49  ;;  %v2176_v59 = vld [vmem:[%s5002_s1 + $0x20] sm:$0xf] }
   0xe   :  { %697 = vmatpush.bf16.msra.mxu3 %v2393_v34  ;;  %v2248_v54 = vld [vmem:[%s5002_s1 + $0xb0] sm:$0xf]  ;;  %v3151_v55 = vld [vmem:[%s5002_s1 + $0xb4] sm:$0xf0]  ;;  %v2377_v58 = vor.u32 %v3183_v53, %v2376_v52  ;;  %v3133_v60 = vld [vmem:[%s5002_s1 + $0x24] sm:$0xf0] }
   0xf   :  { %669 = vmatpush.bf16.msra.mxu1 %v2265_v38  ;;  %v2304_v61 = vld [vmem:[%s5002_s1 + $0x120] sm:$0xf]  ;;  %v2249_v62 = vor.u32 %v3151_v55, %v2248_v54  ;;  %v3165_v63 = vld [vmem:[%s5002_s1 + $0x124] sm:$0xf0]  ;;  %v2177_v4 = vor.u32 %v3133_v60, %v2176_v59  ;;  %v2168_v5 = vld [vmem:[%s5002_s1 + $0x10] sm:$0xf] }
  0x10   :  { %656 = vmatpush.bf16.msra.mxu0 %v2193_v44  ;;  %v2368_v0 = vld [vmem:[%s5002_s1 + $0x1a0] sm:$0xf]  ;;  %v3181_v1 = vld [vmem:[%s5002_s1 + $0x1a4] sm:$0xf0]  ;;  %v2305_v6 = vor.u32 %v3165_v63, %v2304_v61  ;;  %v3131_v8 = vld [vmem:[%s5002_s1 + $0x14] sm:$0xf0] }
  0x11   :  { %684 = vmatpush.bf16.msra.mxu2 %v2321_v45  ;;  %v2240_v2 = vld [vmem:[%s5002_s1 + $0xa0] sm:$0xf]  ;;  %v3149_v3 = vld [vmem:[%s5002_s1 + $0xa4] sm:$0xf0]  ;;  %v2369_v7 = vor.u32 %v3181_v1, %v2368_v0  ;;  %v2296_v9 = vld [vmem:[%s5002_s1 + $0x110] sm:$0xf]  ;;  %v2169_v18 = vor.u32 %v3131_v8, %v2168_v5 }
  0x12   :  { %698 = vmatpush.bf16.msra.mxu3 %v2385_v46  ;;  %v3163_v10 = vld [vmem:[%s5002_s1 + $0x114] sm:$0xf0]  ;;  %v2241_v11 = vor.u32 %v3149_v3, %v2240_v2  ;;  %v2360_v12 = vld [vmem:[%s5002_s1 + $0x190] sm:$0xf]  ;;  %v2160_v16 = vld [vmem:[%s5002_s1] sm:$0xf] }
  0x13   :  { %670 = vmatpush.bf16.msra.mxu1 %v2257_v50  ;;  %v3179_v13 = vld [vmem:[%s5002_s1 + $0x194] sm:$0xf0]  ;;  %v2232_v14 = vld [vmem:[%s5002_s1 + $0x90] sm:$0xf]  ;;  %v3129_v17 = vld [vmem:[%s5002_s1 + $0x4] sm:$0xf0]  ;;  %v2297_v23 = vor.u32 %v3163_v10, %v2296_v9 }
  0x14   :  { %657 = vmatpush.bf16.msra.mxu0 %v2185_v56  ;;  %v3147_v15 = vld [vmem:[%s5002_s1 + $0x94] sm:$0xf0]  ;;  %v2288_v19 = vld [vmem:[%s5002_s1 + $0x100] sm:$0xf]  ;;  %v3161_v20 = vld [vmem:[%s5002_s1 + $0x104] sm:$0xf0]  ;;  %v2361_v24 = vor.u32 %v3179_v13, %v2360_v12  ;;  %v2161_v35 = vor.u32 %v3129_v17, %v2160_v16 }
  0x15   :  { %685 = vmatpush.bf16.msra.mxu2 %v2313_v57  ;;  %v2352_v21 = vld [vmem:[%s5002_s1 + $0x180] sm:$0xf]  ;;  %v3177_v22 = vld [vmem:[%s5002_s1 + $0x184] sm:$0xf0]  ;;  %v2472_v25 = vld [vmem:[%s5002_s1 + $0x270] sm:$0xf]  ;;  %v2233_v28 = vor.u32 %v3147_v15, %v2232_v14  ;;  %v2289_v39 = vor.u32 %v3161_v20, %v2288_v19 }
  0x16   :  { %699 = vmatpush.bf16.msra.mxu3 %v2377_v58  ;;  %v3207_v26 = vld [vmem:[%s5002_s1 + $0x274] sm:$0xf0]  ;;  %v3142_v27 = vld [vmem:[%s5002_s1 + $0x74] sm:$0xf]  ;;  %v2218_v29 = vld [vmem:[%s5002_s1 + $0x78] sm:$0xf0]  ;;  %v2353_v40 = vor.u32 %v3177_v22, %v2352_v21 }
  0x17   :  { %671 = vmatpush.bf16.msra.mxu1 %v2249_v62  ;;  %v2224_v30 = vld [vmem:[%s5002_s1 + $0x80] sm:$0xf]  ;;  %v3145_v31 = vld [vmem:[%s5002_s1 + $0x84] sm:$0xf0]  ;;  %v36_v32 = vld [vmem:[%s5001_s0 + $0x10] sm:$0xff]  ;;  %v2473_v44 = vor.u32 %v3207_v26, %v2472_v25  ;;  %v2221_v45 = vor.u32 %v3142_v27, %v2218_v29 }
  0x18   :  { %658 = vmatpush.bf16.msra.mxu0 %v2177_v4  ;;  %v43_v33 = vld [vmem:[%s5001_s0 + $0x48] sm:$0xff]  ;;  %v2536_v34 = vld [vmem:[%s5002_s1 + $0x2f0] sm:$0xf]  ;;  %v3223_v36 = vld [vmem:[%s5002_s1 + $0x2f4] sm:$0xf0]  ;;  %v2225_v49 = vor.u32 %v3145_v31, %v2224_v30 }
  0x19   :  { %686 = vmatpush.bf16.msra.mxu2 %v2305_v6  ;;  %v2544_v37 = vld [vmem:[%s5002_s1 + $0x300] sm:$0xf]  ;;  %v3225_v38 = vld [vmem:[%s5002_s1 + $0x304] sm:$0xf0]  ;;  %v3158_v41 = vld [vmem:[%s5002_s1 + $0xf4] sm:$0xf]  ;;  %v3730_v54 = vpack.c.bf16 %v43_v33, %v36_v32  ;;  %v2537_v55 = vor.u32 %v3223_v36, %v2536_v34 }
  0x1a   :  { %700 = vmatpush.bf16.msra.mxu3 %v2369_v7  ;;  %v2282_v42 = vld [vmem:[%s5002_s1 + $0xf8] sm:$0xf0]  ;;  %v34_v43 = vld [vmem:[%s5001_s0] sm:$0xff]  ;;  %v44_v48 = vld [vmem:[%s5001_s0 + $0x50] sm:$0xff]  ;;  %v2545_v50 = vor.u32 %v3225_v38, %v2544_v37 }
  0x1b   :  { %672 = vmatpush.bf16.msra.mxu1 %v2241_v11  ;;  %v41_v46 = vld [vmem:[%s5001_s0 + $0x38] sm:$0xff]  ;;  %v2464_v51 = vld [vmem:[%s5002_s1 + $0x260] sm:$0xf]  ;;  %v3205_v52 = vld [vmem:[%s5002_s1 + $0x264] sm:$0xf0]  ;;  %v2285_v59 = vor.u32 %v3158_v41, %v2282_v42 }
  0x1c   :  { %659 = vmatpush.bf16.msra.mxu0 %v2169_v18  ;;  %v37_v47 = vld [vmem:[%s5001_s0 + $0x18] sm:$0xff]  ;;  %v3140_v53 = vld [vmem:[%s5002_s1 + $0x64] sm:$0xf]  ;;  %v2210_v56 = vld [vmem:[%s5002_s1 + $0x68] sm:$0xf0]  ;;  %v3741_v60 = vpack.c.bf16 %v41_v46, %v34_v43  ;;  %v2465_v0 = vor.u32 %v3205_v52, %v2464_v51 }
  0x1d   :  { %687 = vmatpush.bf16.msra.mxu2 %v2297_v23  ;;  %v35_v57 = vld [vmem:[%s5001_s0 + $0x8] sm:$0xff]  ;;  %v42_v58 = vld [vmem:[%s5001_s0 + $0x40] sm:$0xff]  ;;  %v3749_v63 = vpack.c.bf16 %v44_v48, %v37_v47  ;;  %v2213_v3 = vor.u32 %v3140_v53, %v2210_v56  ;;  %v2456_v5 = vld [vmem:[%s5002_s1 + $0x250] sm:$0xf] }
  0x1e   :  { %701 = vmatpush.bf16.msra.mxu3 %v2361_v24  ;;  %v2528_v61 = vld [vmem:[%s5002_s1 + $0x2e0] sm:$0xf]  ;;  %v3221_v62 = vld [vmem:[%s5002_s1 + $0x2e4] sm:$0xf0]  ;;  %v3156_v1 = vld [vmem:[%s5002_s1 + $0xe4] sm:$0xf]  ;;  %v3757_v4 = vpack.c.bf16 %v42_v58, %v35_v57 }
  0x1f   :  { %673 = vmatpush.bf16.msra.mxu1 %v2233_v28  ;;  %v2274_v2 = vld [vmem:[%s5002_s1 + $0xe8] sm:$0xf0]  ;;  %v3203_v6 = vld [vmem:[%s5002_s1 + $0x254] sm:$0xf0]  ;;  %v2529_v7 = vor.u32 %v3221_v62, %v2528_v61  ;;  %v3138_v8 = vld [vmem:[%s5002_s1 + $0x54] sm:$0xf] }
  0x20   :  { %660 = vmatpush.bf16.msra.mxu0 %v2161_v35  ;;  %v2202_v9 = vld [vmem:[%s5002_s1 + $0x58] sm:$0xf0]  ;;  %v2277_v10 = vor.u32 %v3156_v1, %v2274_v2  ;;  %v2520_v11 = vld [vmem:[%s5002_s1 + $0x2d0] sm:$0xf]  ;;  %v3219_v12 = vld [vmem:[%s5002_s1 + $0x2d4] sm:$0xf0]  ;;  %v2457_v13 = vor.u32 %v3203_v6, %v2456_v5 }
  0x21   :  { %688 = vmatpush.bf16.msra.mxu2 %v2289_v39  ;;  %v3154_v14 = vld [vmem:[%s5002_s1 + $0xd4] sm:$0xf]  ;;  %v2266_v15 = vld [vmem:[%s5002_s1 + $0xd8] sm:$0xf0]  ;;  %v2205_v16 = vor.u32 %v3138_v8, %v2202_v9  ;;  %v2448_v17 = vld [vmem:[%s5002_s1 + $0x240] sm:$0xf]  ;;  %v2521_v19 = vor.u32 %v3219_v12, %v2520_v11 }
  0x22   :  { %702 = vmatpush.bf16.msra.mxu3 %v2353_v40  ;;  %v3201_v18 = vld [vmem:[%s5002_s1 + $0x244] sm:$0xf0]  ;;  %v3136_v20 = vld [vmem:[%s5002_s1 + $0x44] sm:$0xf]  ;;  %v2194_v21 = vld [vmem:[%s5002_s1 + $0x48] sm:$0xf0]  ;;  %v2269_v22 = vor.u32 %v3154_v14, %v2266_v15 }
  0x23   :  { %674 = vmatpush.bf16.msra.mxu1 %v2225_v49  ;;  %661 = vmatmul.bf16.vlgmr.msra.gmra.mxu0 %v3741_v60  ;;  %v2512_v23 = vld [vmem:[%s5002_s1 + $0x2c0] sm:$0xf]  ;;  %v3217_v24 = vld [vmem:[%s5002_s1 + $0x2c4] sm:$0xf0]  ;;  %v2449_v25 = vor.u32 %v3201_v18, %v2448_v17  ;;  %v3152_v26 = vld [vmem:[%s5002_s1 + $0xc4] sm:$0xf]  ;;  %v2197_v28 = vor.u32 %v3136_v20, %v2194_v21 }
  0x24   :  { %709 = vmatpush.bf16.msrb.mxu0 %v2473_v44  ;;  %689 = vmatmul.bf16.vlgmr.msra.gmra.mxu2 %v3730_v54  ;;  %v2258_v27 = vld [vmem:[%s5002_s1 + $0xc8] sm:$0xf0]  ;;  %v2440_v29 = vld [vmem:[%s5002_s1 + $0x230] sm:$0xf]  ;;  %v3199_v30 = vld [vmem:[%s5002_s1 + $0x234] sm:$0xf0]  ;;  %v2513_v31 = vor.u32 %v3217_v24, %v2512_v23 }
  0x25   :  { %744 = vmatpush.bf16.msrb.mxu2 %v2545_v50  ;;  %703 = vmatmul.bf16.vlgmr.msra.gmra.mxu3 %v3749_v63  ;;  %v3134_v32 = vld [vmem:[%s5002_s1 + $0x34] sm:$0xf]  ;;  %v2186_v33 = vld [vmem:[%s5002_s1 + $0x38] sm:$0xf0]  ;;  %v2504_v34 = vld [vmem:[%s5002_s1 + $0x2b0] sm:$0xf]  ;;  %v2261_v35 = vor.u32 %v3152_v26, %v2258_v27  ;;  %v2441_v39 = vor.u32 %v3199_v30, %v2440_v29 }
  0x26   :  { %751 = vmatpush.bf16.msrb.mxu3 %v2221_v45  ;;  %675 = vmatmul.bf16.vlgmr.msra.gmra.mxu1 %v3757_v4  ;;  %v3215_v36 = vld [vmem:[%s5002_s1 + $0x2b4] sm:$0xf0]  ;;  %v40_v37 = vld [vmem:[%s5001_s0 + $0x30] sm:$0xff]  ;;  %v47_v38 = vld [vmem:[%s5001_s0 + $0x68] sm:$0xff]  ;;  %v2189_v42 = vor.u32 %v3134_v32, %v2186_v33 }
  0x27   :  { %723 = vmatpush.bf16.msrb.mxu1 %v2537_v55  ;;  %v3150_v40 = vld [vmem:[%s5002_s1 + $0xb4] sm:$0xf]  ;;  %v2250_v41 = vld [vmem:[%s5002_s1 + $0xb8] sm:$0xf0]  ;;  %v2432_v43 = vld [vmem:[%s5002_s1 + $0x220] sm:$0xf]  ;;  %v2505_v45 = vor.u32 %v3215_v36, %v2504_v34  ;;  %v3853_v48 = vpack.c.bf16 %v47_v38, %v40_v37 }
  0x28   :  { %710 = vmatpush.bf16.msrb.mxu0 %v2465_v0  ;;  %v3197_v44 = vld [vmem:[%s5002_s1 + $0x224] sm:$0xf0]  ;;  %v3132_v46 = vld [vmem:[%s5002_s1 + $0x24] sm:$0xf]  ;;  %v2178_v47 = vld [vmem:[%s5002_s1 + $0x28] sm:$0xf0]  ;;  %v2253_v49 = vor.u32 %v3150_v40, %v2250_v41 }
  0x29   :  { %765 = vmatpush.bf16.msra.mxu2 %v2285_v59  ;;  %v2496_v50 = vld [vmem:[%s5002_s1 + $0x2a0] sm:$0xf]  ;;  %v3213_v51 = vld [vmem:[%s5002_s1 + $0x2a4] sm:$0xf0]  ;;  %v2433_v52 = vor.u32 %v3197_v44, %v2432_v43  ;;  %v3148_v53 = vld [vmem:[%s5002_s1 + $0xa4] sm:$0xf]  ;;  %v2181_v56 = vor.u32 %v3132_v46, %v2178_v47 }
  0x2a   :  { %752 = vmatpush.bf16.msrb.mxu3 %v2213_v3  ;;  %v2242_v55 = vld [vmem:[%s5002_s1 + $0xa8] sm:$0xf0]  ;;  %v2424_v57 = vld [vmem:[%s5002_s1 + $0x210] sm:$0xf]  ;;  %v3195_v58 = vld [vmem:[%s5002_s1 + $0x214] sm:$0xf0]  ;;  %v2497_v61 = vor.u32 %v3213_v51, %v2496_v50 }
  0x2b   :  { %724 = vmatpush.bf16.msrb.mxu1 %v2529_v7  ;;  %v3130_v59 = vld [vmem:[%s5002_s1 + $0x14] sm:$0xf]  ;;  %v2170_v62 = vld [vmem:[%s5002_s1 + $0x18] sm:$0xf0]  ;;  %v2488_v0 = vld [vmem:[%s5002_s1 + $0x290] sm:$0xf]  ;;  %v2245_v2 = vor.u32 %v3148_v53, %v2242_v55  ;;  %v2425_v7 = vor.u32 %v3195_v58, %v2424_v57 }
  0x2c   :  { %711 = vmatpush.bf16.msrb.mxu0 %v2457_v13  ;;  %v3211_v1 = vld [vmem:[%s5002_s1 + $0x294] sm:$0xf0]  ;;  %v3146_v3 = vld [vmem:[%s5002_s1 + $0x94] sm:$0xf]  ;;  %v2234_v5 = vld [vmem:[%s5002_s1 + $0x98] sm:$0xf0]  ;;  %v2173_v11 = vor.u32 %v3130_v59, %v2170_v62 }
  0x2d   :  { %766 = vmatpush.bf16.msra.mxu2 %v2277_v10  ;;  %v2416_v6 = vld [vmem:[%s5002_s1 + $0x200] sm:$0xf]  ;;  %v3193_v8 = vld [vmem:[%s5002_s1 + $0x204] sm:$0xf0]  ;;  %v3128_v9 = vld [vmem:[%s5002_s1 + $0x4] sm:$0xf]  ;;  %v2489_v15 = vor.u32 %v3211_v1, %v2488_v0 }
  0x2e   :  { %753 = vmatpush.bf16.msrb.mxu3 %v2205_v16  ;;  %v2162_v10 = vld [vmem:[%s5002_s1 + $0x8] sm:$0xf0]  ;;  %v3174_v12 = vld [vmem:[%s5002_s1 + $0x174] sm:$0xf]  ;;  %v2346_v13 = vld [vmem:[%s5002_s1 + $0x178] sm:$0xf0]  ;;  %v2417_v23 = vor.u32 %v3193_v8, %v2416_v6 }
  0x2f   :  { %725 = vmatpush.bf16.msrb.mxu1 %v2521_v19  ;;  %v3206_v14 = vld [vmem:[%s5002_s1 + $0x274] sm:$0xf]  ;;  %v2474_v16 = vld [vmem:[%s5002_s1 + $0x278] sm:$0xf0]  ;;  %v2480_v17 = vld [vmem:[%s5002_s1 + $0x280] sm:$0xf]  ;;  %v2237_v19 = vor.u32 %v3146_v3, %v2234_v5  ;;  %v2165_v27 = vor.u32 %v3128_v9, %v2162_v10 }
  0x30   :  { %712 = vmatpush.bf16.msrb.mxu0 %v2449_v25  ;;  %v3209_v18 = vld [vmem:[%s5002_s1 + $0x284] sm:$0xf0]  ;;  %v38_v20 = vld [vmem:[%s5001_s0 + $0x20] sm:$0xff]  ;;  %v45_v21 = vld [vmem:[%s5001_s0 + $0x58] sm:$0xff]  ;;  %v2477_v32 = vor.u32 %v3206_v14, %v2474_v16 }
  0x31   :  { %767 = vmatpush.bf16.msra.mxu2 %v2269_v22  ;;  %v3144_v22 = vld [vmem:[%s5002_s1 + $0x84] sm:$0xf]  ;;  %v2226_v24 = vld [vmem:[%s5002_s1 + $0x88] sm:$0xf0]  ;;  %v3190_v25 = vld [vmem:[%s5002_s1 + $0x1f4] sm:$0xf]  ;;  %v2481_v33 = vor.u32 %v3209_v18, %v2480_v17  ;;  %v3959_v37 = vpack.c.bf16 %v45_v21, %v38_v20 }
  0x32   :  { %754 = vmatpush.bf16.msrb.mxu3 %v2197_v28  ;;  %v2410_v26 = vld [vmem:[%s5002_s1 + $0x1f8] sm:$0xf0]  ;;  %v2349_v28 = vor.u32 %v3174_v12, %v2346_v13  ;;  %v3222_v29 = vld [vmem:[%s5002_s1 + $0x2f4] sm:$0xf]  ;;  %v46_v34 = vld [vmem:[%s5001_s0 + $0x60] sm:$0xff]  ;;  %v2229_v38 = vor.u32 %v3144_v22, %v2226_v24 }
  0x33   :  { %726 = vmatpush.bf16.msrb.mxu1 %v2513_v31  ;;  %v2538_v30 = vld [vmem:[%s5002_s1 + $0x2f8] sm:$0xf0]  ;;  %v39_v31 = vld [vmem:[%s5001_s0 + $0x28] sm:$0xff]  ;;  %v2413_v41 = vor.u32 %v3190_v25, %v2410_v26  ;;  %v3188_v43 = vld [vmem:[%s5002_s1 + $0x1e4] sm:$0xf] }
  0x34   :  { %713 = vmatpush.bf16.msrb.mxu0 %v2441_v39  ;;  %2550 = vmatmul.msk.bf16.vlgmr.msrb.gmra.mxu2 %vm649_vm0, %v3853_v48  ;;  %v2338_v36 = vld [vmem:[%s5002_s1 + $0x168] sm:$0xf0]  ;;  %v3204_v39 = vld [vmem:[%s5002_s1 + $0x264] sm:$0xf]  ;;  %v3970_v44 = vpack.c.bf16 %v46_v34, %v39_v31  ;;  %v3170_v51 = vld [vmem:[%s5002_s1 + $0x154] sm:$0xf] }
  0x35   :  { %768 = vmatpush.bf16.msra.mxu2 %v2261_v35  ;;  %v3172_v35 = vld [vmem:[%s5002_s1 + $0x164] sm:$0xf]  ;;  %v2466_v40 = vld [vmem:[%s5002_s1 + $0x268] sm:$0xf0]  ;;  %v3202_v53 = vld [vmem:[%s5002_s1 + $0x254] sm:$0xf] }
  0x36   :  { %755 = vmatpush.bf16.msrb.mxu3 %v2189_v42  ;;  %v2541_v42 = vor.u32 %v3222_v29, %v2538_v30  ;;  %v2402_v46 = vld [vmem:[%s5002_s1 + $0x1e8] sm:$0xf0]  ;;  %v3220_v47 = vld [vmem:[%s5002_s1 + $0x2e4] sm:$0xf]  ;;  %v2469_v50 = vor.u32 %v3204_v39, %v2466_v40  ;;  %v2458_v55 = vld [vmem:[%s5002_s1 + $0x258] sm:$0xf0] }
  0x37   :  { %727 = vmatpush.bf16.msrb.mxu1 %v2505_v45  ;;  %v2341_v45 = vor.u32 %v3172_v35, %v2338_v36  ;;  %v3186_v58 = vld [vmem:[%s5002_s1 + $0x1d4] sm:$0xf]  ;;  %v2522_v0 = vld [vmem:[%s5002_s1 + $0x2d8] sm:$0xf0]  ;;  %v2461_v1 = vor.u32 %v3202_v53, %v2458_v55  ;;  %v2322_v3 = vld [vmem:[%s5002_s1 + $0x148] sm:$0xf0] }
  0x38   :  { %714 = vmatpush.bf16.msrb.mxu0 %v2433_v52  ;;  %v2330_v52 = vld [vmem:[%s5002_s1 + $0x158] sm:$0xf0]  ;;  %v3218_v62 = vld [vmem:[%s5002_s1 + $0x2d4] sm:$0xf]  ;;  %v3200_v5 = vld [vmem:[%s5002_s1 + $0x244] sm:$0xf] }
  0x39   :  { %769 = vmatpush.bf16.msra.mxu2 %v2253_v49  ;;  %v2530_v49 = vld [vmem:[%s5002_s1 + $0x2e8] sm:$0xf0]  ;;  %v2333_v59 = vor.u32 %v3170_v51, %v2330_v52  ;;  %v2525_v8 = vor.u32 %v3218_v62, %v2522_v0  ;;  %v3184_v9 = vld [vmem:[%s5002_s1 + $0x1c4] sm:$0xf] }
  0x3a   :  { %756 = vmatpush.bf16.msrb.mxu3 %v2181_v56  ;;  %v2405_v56 = vor.u32 %v3188_v43, %v2402_v46  ;;  %v2533_v57 = vor.u32 %v3220_v47, %v2530_v49  ;;  %v2450_v6 = vld [vmem:[%s5002_s1 + $0x248] sm:$0xf0]  ;;  %v3216_v10 = vld [vmem:[%s5002_s1 + $0x2c4] sm:$0xf] }
  0x3b   :  { %728 = vmatpush.bf16.msrb.mxu1 %v2497_v61  ;;  %v2394_v61 = vld [vmem:[%s5002_s1 + $0x1d8] sm:$0xf0] }
  0x3c   :  { %715 = vmatpush.bf16.msrb.mxu0 %v2425_v7  ;;  %v2397_v7 = vor.u32 %v3186_v58, %v2394_v61 }
  0x3d   :  { %770 = vmatpush.bf16.msra.mxu2 %v2245_v2  ;;  %v3168_v2 = vld [vmem:[%s5002_s1 + $0x144] sm:$0xf] }
  0x3e   :  { %757 = vmatpush.bf16.msrb.mxu3 %v2173_v11  ;;  %v2325_v11 = vor.u32 %v3168_v2, %v2322_v3 }
  0x3f   :  { %729 = vmatpush.bf16.msrb.mxu1 %v2489_v15 }
  0x40   :  { %716 = vmatpush.bf16.msrb.mxu0 %v2417_v23 }
  0x41   :  { %771 = vmatpush.bf16.msra.mxu2 %v2237_v19 }
  0x42   :  { %758 = vmatpush.bf16.msrb.mxu3 %v2165_v27 }
  0x43   :  { %730 = vmatpush.bf16.msrb.mxu1 %v2481_v33  ;;  %717 = vmatmul.bf16.vlgmr.msrb.gmra.mxu0 %v3959_v37 }
  0x44   :  { %779 = vmatpush.bf16.msra.mxu0 %v2349_v28 }
  0x45   :  { %772 = vmatpush.bf16.msra.mxu2 %v2229_v38  ;;  %759 = vmatmul.bf16.vlgmr.msrb.gmra.mxu3 %v3741_v60  ;;  %v2514_v60 = vld [vmem:[%s5002_s1 + $0x2c8] sm:$0xf0] }
  0x46   :  { %807 = vmatpush.bf16.msra.mxu3 %v2477_v32  ;;  %731 = vmatmul.bf16.vlgmr.msrb.gmra.mxu1 %v3970_v44 }
  0x47   :  { %793 = vmatpush.bf16.msra.mxu1 %v2413_v41 }
  0x48   :  { %780 = vmatpush.bf16.msra.mxu0 %v2341_v45  ;;  %773 = vmatmul.bf16.vlgmr.msra.gmra.mxu2 %v3757_v4  ;;  %v2386_v4 = vld [vmem:[%s5002_s1 + $0x1c8] sm:$0xf0] }
  0x49   :  { %821 = vmatpush.bf16.msrb.mxu2 %v2541_v42 }
  0x4a   :  { %808 = vmatpush.bf16.msra.mxu3 %v2469_v50 }
  0x4b   :  { %794 = vmatpush.bf16.msra.mxu1 %v2405_v56 }
  0x4c   :  { %781 = vmatpush.bf16.msra.mxu0 %v2333_v59 }
  0x4d   :  { %822 = vmatpush.bf16.msrb.mxu2 %v2533_v57 }
  0x4e   :  { %14 = vsyncpa [#allocation3], 0  ;;  %809 = vmatpush.bf16.msra.mxu3 %v2461_v1  ;;  %v2453_v12 = vor.u32 %v3200_v5, %v2450_v6  ;;  %v3166_v13 = vld [vmem:[%s5002_s1 + $0x134] sm:$0xf]  ;;  %v2314_v14 = vld [vmem:[%s5002_s1 + $0x138] sm:$0xf0]  ;;  %v2389_v17 = vor.u32 %v3184_v9, %v2386_v4  ;;  %v2517_v18 = vor.u32 %v3216_v10, %v2514_v60 }
  0x4f   :  { %v3198_v15 = vld [vmem:[%s5002_s1 + $0x234] sm:$0xf]  ;;  %v2442_v16 = vld [vmem:[%s5002_s1 + $0x238] sm:$0xf0]  ;;  %795 = vmatpush.bf16.msra.mxu1 %v2397_v7  ;;  %v2317_v20 = vor.u32 %v3166_v13, %v2314_v14  ;;  %v3164_v25 = vld [vmem:[%s5002_s1 + $0x124] sm:$0xf] }
  0x50   :  { %v3182_v19 = vld [vmem:[%s5002_s1 + $0x1b4] sm:$0xf]  ;;  %782 = vmatpush.bf16.msra.mxu0 %v2325_v11  ;;  %v2378_v21 = vld [vmem:[%s5002_s1 + $0x1b8] sm:$0xf0]  ;;  %v2445_v24 = vor.u32 %v3198_v15, %v2442_v16  ;;  %v2306_v26 = vld [vmem:[%s5002_s1 + $0x128] sm:$0xf0] }
  0x51   :  { %823 = vmatpush.bf16.msrb.mxu2 %v2525_v8  ;;  %v3214_v22 = vld [vmem:[%s5002_s1 + $0x2b4] sm:$0xf]  ;;  %v2506_v23 = vld [vmem:[%s5002_s1 + $0x2b8] sm:$0xf0]  ;;  %v3196_v27 = vld [vmem:[%s5002_s1 + $0x224] sm:$0xf]  ;;  %v2381_v29 = vor.u32 %v3182_v19, %v2378_v21  ;;  %v2309_v32 = vor.u32 %v3164_v25, %v2306_v26 }
  0x52   :  { %810 = vmatpush.bf16.msra.mxu3 %v2453_v12  ;;  %v2434_v28 = vld [vmem:[%s5002_s1 + $0x228] sm:$0xf0]  ;;  %v2509_v30 = vor.u32 %v3214_v22, %v2506_v23  ;;  %v3180_v31 = vld [vmem:[%s5002_s1 + $0x1a4] sm:$0xf]  ;;  %v3162_v38 = vld [vmem:[%s5002_s1 + $0x114] sm:$0xf] }
  0x53   :  { %796 = vmatpush.bf16.msra.mxu1 %v2389_v17  ;;  %v2370_v33 = vld [vmem:[%s5002_s1 + $0x1a8] sm:$0xf0]  ;;  %v3212_v34 = vld [vmem:[%s5002_s1 + $0x2a4] sm:$0xf]  ;;  %v2437_v36 = vor.u32 %v3196_v27, %v2434_v28  ;;  %v2298_v39 = vld [vmem:[%s5002_s1 + $0x118] sm:$0xf0] }
  0x54   :  { %783 = vmatpush.bf16.msra.mxu0 %v2317_v20  ;;  %v2498_v35 = vld [vmem:[%s5002_s1 + $0x2a8] sm:$0xf0]  ;;  %v3194_v40 = vld [vmem:[%s5002_s1 + $0x214] sm:$0xf]  ;;  %v2426_v41 = vld [vmem:[%s5002_s1 + $0x218] sm:$0xf0]  ;;  %v2373_v42 = vor.u32 %v3180_v31, %v2370_v33  ;;  %v2301_v46 = vor.u32 %v3162_v38, %v2298_v39 }
  0x55   :  { %824 = vmatpush.bf16.msrb.mxu2 %v2517_v18  ;;  %v2501_v43 = vor.u32 %v3212_v34, %v2498_v35  ;;  %v3178_v45 = vld [vmem:[%s5002_s1 + $0x194] sm:$0xf]  ;;  %v2362_v47 = vld [vmem:[%s5002_s1 + $0x198] sm:$0xf0]  ;;  %v2429_v51 = vor.u32 %v3194_v40, %v2426_v41  ;;  %v3160_v52 = vld [vmem:[%s5002_s1 + $0x104] sm:$0xf] }
  0x56   :  { %811 = vmatpush.bf16.msra.mxu3 %v2445_v24  ;;  %v3210_v49 = vld [vmem:[%s5002_s1 + $0x294] sm:$0xf]  ;;  %v2490_v50 = vld [vmem:[%s5002_s1 + $0x298] sm:$0xf0]  ;;  %v2290_v53 = vld [vmem:[%s5002_s1 + $0x108] sm:$0xf0]  ;;  %v2365_v59 = vor.u32 %v3178_v45, %v2362_v47 }
  0x57   :  { %797 = vmatpush.bf16.msra.mxu1 %v2381_v29  ;;  %v3192_v55 = vld [vmem:[%s5002_s1 + $0x204] sm:$0xf]  ;;  %v2418_v56 = vld [vmem:[%s5002_s1 + $0x208] sm:$0xf0]  ;;  %v2493_v61 = vor.u32 %v3210_v49, %v2490_v50  ;;  %v2293_v62 = vor.u32 %v3160_v52, %v2290_v53  ;;  %v3233_v9 = vld [vmem:[%s5004_s3 + $0x38] sm:$0xff]  ;;  %s2146_s18 = sshll.u32 %s5010_s9, 4  ;;  %s2147_s18 = int_to_ptr.hbm [resolvable:$true] %s2146_s18 }
  0x58   :  { %784 = vmatpush.bf16.msra.mxu0 %v2309_v32  ;;  %v3224_v57 = vld [vmem:[%s5002_s1 + $0x304] sm:$0xf]  ;;  %v2546_v58 = vld [vmem:[%s5002_s1 + $0x308] sm:$0xf0]  ;;  %v2421_v2 = vor.u32 %v3192_v55, %v2418_v56  ;;  %v3232_v4 = vld [vmem:[%s5004_s3 + $0x30] sm:$0xff]  ;;  %s3429_s19 = smov 896  }
  0x59   :  { %825 = vmatpush.bf16.msrb.mxu2 %v2509_v30  ;;  %v3176_v0 = vld [vmem:[%s5002_s1 + $0x184] sm:$0xf]  ;;  %v2354_v1 = vld [vmem:[%s5002_s1 + $0x188] sm:$0xf0]  ;;  %v2549_v6 = vor.u32 %v3224_v57, %v2546_v58  ;;  %v153_v10 = vld [vmem:[%s5003_s2] sm:$0x3] }
  0x5a   :  { %812 = vmatpush.bf16.msra.mxu3 %v2437_v36  ;;  %v3208_v3 = vld [vmem:[%s5002_s1 + $0x284] sm:$0xf]  ;;  %v2482_v5 = vld [vmem:[%s5002_s1 + $0x288] sm:$0xf0]  ;;  %v2357_v7 = vor.u32 %v3176_v0, %v2354_v1  ;;  %v155_v14 = vperm.slane %v153_v10, 0  ;;  %v3241_v22 = vld [vmem:[%s5004_s3 + $0x78] sm:$0xff] }
  0x5b   :  { %798 = vmatpush.bf16.msra.mxu1 %v2373_v42  ;;  %v2485_v8 = vor.u32 %v3208_v3, %v2482_v5  ;;  %v3226_v12 = vld [vmem:[%s5004_s3] sm:$0xff]  ;;  %v3240_v27 = vld [vmem:[%s5004_s3 + $0x70] sm:$0xff]  ;;  %v3239_v33 = vld [vmem:[%s5004_s3 + $0x68] sm:$0xff]  ;;  %v156_v57 = vperm.slane %v153_v10, 1  ;;  %s3430_s20 = smov 56  }
  0x5c   :  { %785 = vmatpush.bf16.msra.mxu0 %v2301_v46  ;;  %v3238_v38 = vld [vmem:[%s5004_s3 + $0x60] sm:$0xff]  ;;  %v3237_v45 = vld [vmem:[%s5004_s3 + $0x58] sm:$0xff]  ;;  %v3236_v50 = vld [vmem:[%s5004_s3 + $0x50] sm:$0xff] }
  0x5d   :  { %826 = vmatpush.bf16.msrb.mxu2 %v2501_v43  ;;  %v3235_v53 = vld [vmem:[%s5004_s3 + $0x48] sm:$0xff]  ;;  %v3234_v56 = vld [vmem:[%s5004_s3 + $0x40] sm:$0xff] }
  0x5e   :  { %813 = vmatpush.bf16.msra.mxu3 %v2429_v51 }
  0x5f   :  { %799 = vmatpush.bf16.msra.mxu1 %v2365_v59 }
  0x60   :  { %786 = vmatpush.bf16.msra.mxu0 %v2293_v62 }
  0x61   :  { %827 = vmatpush.bf16.msrb.mxu2 %v2493_v61 }
  0x62   :  { %814 = vmatpush.bf16.msra.mxu3 %v2421_v2 }
  0x63   :  { %800 = vmatpush.bf16.msra.mxu1 %v2357_v7  ;;  %787 = vmatmul.bf16.vlgmr.msra.gmra.mxu0 %v3730_v54  ;;  %v3231_v54 = vld [vmem:[%s5004_s3 + $0x28] sm:$0xff] }
  0x64   :  { %842 = vmatpush.bf16.msrb.mxu0 %v2549_v6 }
  0x65   :  { %815 = vmatmul.bf16.vlgmr.msra.gmra.mxu3 %v3959_v37  ;;  %828 = vmatpush.bf16.msrb.mxu2 %v2485_v8  ;;  %v3228_v37 = vld [vmem:[%s5004_s3 + $0x10] sm:$0xff] }
  0x66   :  { %801 = vmatmul.bf16.vlgmr.msra.gmra.mxu1 %v3749_v63  ;;  %v3230_v63 = vld [vmem:[%s5004_s3 + $0x20] sm:$0xff]  ;;  %1001 = vmatpush.bf16.msrb.mxu3 %v3241_v22 }
  0x67   :  { %987 = vmatpush.bf16.msrb.mxu1 %v3233_v9 }
  0x68   :  { %829 = vmatmul.bf16.vlgmr.msrb.gmra.mxu2 %v3970_v44  ;;  %v3227_v44 = vld [vmem:[%s5004_s3 + $0x8] sm:$0xff] }
  0x6a   :  { %1002 = vmatpush.bf16.msrb.mxu3 %v3240_v27  ;;  %v3254_v27 = vld [vmem:[%s5006_s5 + $0x64] sm:$0xf] }
  0x6b   :  { %988 = vmatpush.bf16.msrb.mxu1 %v3232_v4 }
  0x6e   :  { %1003 = vmatpush.bf16.msrb.mxu3 %v3239_v33  ;;  %v3252_v33 = vld [vmem:[%s5006_s5 + $0x54] sm:$0xf] }
  0x6f   :  { %989 = vmatpush.bf16.msrb.mxu1 %v3231_v54 }
  0x72   :  { %1004 = vmatpush.bf16.msrb.mxu3 %v3238_v38  ;;  %v2650_v38 = vld [vmem:[%s5006_s5 + $0x40] sm:$0xf] }
  0x73   :  { %2551 = vmatmul.msk.bf16.vlgmr.msrb.gmra.mxu0 %vm649_vm0, %v3853_v48  ;;  %990 = vmatpush.bf16.msrb.mxu1 %v3230_v63  ;;  %v3229_v48 = vld [vmem:[%s5004_s3 + $0x18] sm:$0xff] }
  0x76   :  { %1005 = vmatpush.bf16.msrb.mxu3 %v3237_v45  ;;  %v2642_v45 = vld [vmem:[%s5006_s5 + $0x30] sm:$0xf] }
  0x77   :  { %991 = vmatpush.bf16.msrb.mxu1 %v3229_v48 }
  0x7a   :  { %1006 = vmatpush.bf16.msrb.mxu3 %v3236_v50  ;;  %v2644_v50 = vld [vmem:[%s5006_s5 + $0x38] sm:$0xf0] }
  0x7b   :  { %992 = vmatpush.bf16.msrb.mxu1 %v3228_v37 }
  0x7e   :  { %1007 = vmatpush.bf16.msrb.mxu3 %v3235_v53  ;;  %v3247_v53 = vld [vmem:[%s5006_s5 + $0x24] sm:$0xf0] }
  0x7f   :  { %993 = vmatpush.bf16.msrb.mxu1 %v3227_v44 }
  0x82   :  { %1008 = vmatpush.bf16.msrb.mxu3 %v3234_v56 }
  0x83   :  { %994 = vmatpush.bf16.msrb.mxu1 %v3226_v12 }
  0xa0   :  { %v662_v11 = vpop.f32.mrf.mxu0 }
  0xa1   :  { %v663_v15 = vadd.f32 %v662_v11, %v155_v14 }
  0xa3   :  { %v676_v13 = vpop.f32.mrf.mxu1 }
  0xa4   :  { %v677_v18 = vadd.f32 %v676_v13, %v663_v15 }
  0xa7   :  { %v690_v60 = vpop.f32.mrf.mxu2 }
  0xa8   :  { %v664_v16 = vpop.f32.mrf.mxu0  ;;  %v704_v19 = vpop.f32.mrf.mxu3  ;;  %v691_v23 = vadd.f32 %v690_v60, %v677_v18 }
  0xa9   :  { %v665_v21 = vadd.f32 %v664_v16, %v155_v14 }
  0xaa   :  { %v705_v28 = vadd.f32 %v704_v19, %v691_v23  ;;  %v2674_v19 = vld [vmem:[%s5006_s5 + $0x70] sm:$0xf]  ;;  %v2676_v23 = vld [vmem:[%s5006_s5 + $0x78] sm:$0xf0] }
  0xab   :  { %v678_v20 = vpop.f32.mrf.mxu1 }
  0xac   :  { %v679_v24 = vadd.f32 %v678_v20, %v665_v21  ;;  %v3257_v20 = vld [vmem:[%s5006_s5 + $0x74] sm:$0xf0]  ;;  %v3256_v21 = vld [vmem:[%s5006_s5 + $0x74] sm:$0xf] }
  0xad   :  { %v2675_v22 = vor.u32 %v3257_v20, %v2674_v19 }
  0xaf   :  { %v692_v17 = vpop.f32.mrf.mxu2  ;;  %1120 = vmatpush.bf16.msra.mxu0 %v2675_v22  ;;  %v3296_v22 = vld [vmem:[%s5008_s7 + $0x130] sm:$0xf0] }
  0xb0   :  { %v693_v30 = vadd.f32 %v692_v17, %v679_v24  ;;  %v706_v32 = vpop.f32.mrf.mxu3  ;;  %v2666_v24 = vld [vmem:[%s5006_s5 + $0x60] sm:$0xf] }
  0xb2   :  { %v707_v34 = vadd.f32 %v706_v32, %v693_v30  ;;  %v3253_v32 = vld [vmem:[%s5006_s5 + $0x54] sm:$0xf0] }
  0xb7   :  { %v746_v26 = vpop.f32.mrf.mxu2 }
  0xbf   :  { %v748_v41 = vpop.f32.mrf.mxu2 }
  0xc0   :  { %v718_v25 = vpop.f32.mrf.mxu0 }
  0xc1   :  { %v719_v31 = vadd.f32 %v718_v25, %v705_v28  ;;  %v3255_v25 = vld [vmem:[%s5006_s5 + $0x64] sm:$0xf0]  ;;  %v2668_v28 = vld [vmem:[%s5006_s5 + $0x68] sm:$0xf0] }
  0xc2   :  { %v2671_v30 = vor.u32 %v3254_v27, %v2668_v28  ;;  %v3356_v28 = vld [vmem:[%s5008_s7 + $0x314] sm:$0xf] }
  0xc3   :  { %v732_v29 = vpop.f32.mrf.mxu1 }
  0xc4   :  { %v733_v35 = vadd.f32 %v732_v29, %v719_v31  ;;  %v2667_v29 = vor.u32 %v3255_v25, %v2666_v24  ;;  %v2658_v31 = vld [vmem:[%s5006_s5 + $0x50] sm:$0xf]  ;;  %v2824_v24 = vld [vmem:[%s5008_s7 + $0x134] sm:$0xf0] }
  0xc5   :  { %v3074_v25 = vld [vmem:[%s5008_s7 + $0x310] sm:$0xf] }
  0xc6   :  { %v747_v42 = vadd.f32 %v746_v26, %v733_v35  ;;  %v2679_v26 = vor.u32 %v3256_v21, %v2676_v23  ;;  %1121 = vmatpush.bf16.msra.mxu0 %v2667_v29  ;;  %v2659_v35 = vor.u32 %v3253_v32, %v2658_v31  ;;  %v2822_v21 = vld [vmem:[%s5008_s7 + $0x118] sm:$0xf]  ;;  %v3293_v23 = vld [vmem:[%s5008_s7 + $0x11c] sm:$0xf]  ;;  %v3076_v29 = vld [vmem:[%s5008_s7 + $0x32c] sm:$0xf0] }
  0xc7   :  { %v3079_v31 = vor.u32 %v3356_v28, %v3076_v29  ;;  %v2794_v32 = vld [vmem:[%s5008_s7 + $0xe0] sm:$0xf]  ;;  %v3261_v29 = vld [vmem:[%s5008_s7 + $0x18] sm:$0xf0] }
  0xc8   :  { %v720_v36 = vpop.f32.mrf.mxu0  ;;  %v849_v47 = vmax.f32 %v747_v42, 0.0  ;;  %v760_v52 = vpop.f32.mrf.mxu3  ;;  %1134 = vmatpush.bf16.msra.mxu2 %v2679_v26  ;;  %v3359_v26 = vld [vmem:[%s5008_s7 + $0x328] sm:$0xf0]  ;;  %v2682_v28 = vld [vmem:[%s5008_s7] sm:$0xf] }
  0xc9   :  { %v721_v39 = vadd.f32 %v720_v36, %v707_v34  ;;  %v761_v62 = vadd.f32 %v760_v52, %v156_v57  ;;  %v2660_v34 = vld [vmem:[%s5006_s5 + $0x58] sm:$0xf0]  ;;  %v2634_v52 = vld [vmem:[%s5006_s5 + $0x20] sm:$0xf]  ;;  %v3075_v27 = vor.u32 %v3359_v26, %v3074_v25 }
  0xca   :  { %v2663_v36 = vor.u32 %v3252_v33, %v2660_v34  ;;  %1122 = vmatpush.bf16.msra.mxu0 %v2659_v35  ;;  %v2635_v56 = vor.u32 %v3247_v53, %v2634_v52  ;;  %v3289_v33 = vld [vmem:[%s5008_s7 + $0xf8] sm:$0xf0]  ;;  %v2827_v34 = vor.u32 %v3293_v23, %v2824_v24  ;;  %v3046_v35 = vld [vmem:[%s5008_s7 + $0x2d8] sm:$0xf]  ;;  %v2766_v53 = vld [vmem:[%s5008_s7 + $0xa8] sm:$0xf] }
  0xcb   :  { %v734_v40 = vpop.f32.mrf.mxu1  ;;  %v774_v55 = vpop.f32.mrf.mxu2  ;;  %v3321_v23 = vld [vmem:[%s5008_s7 + $0x1fc] sm:$0xf]  ;;  %v2936_v24 = vld [vmem:[%s5008_s7 + $0x214] sm:$0xf0] }
  0xcc   :  { %v735_v43 = vadd.f32 %v734_v40, %v721_v39  ;;  %v775_v1 = vadd.f32 %v774_v55, %v761_v62  ;;  %1135 = vmatpush.bf16.msra.mxu2 %v2671_v30  ;;  %v3251_v39 = vld [vmem:[%s5006_s5 + $0x44] sm:$0xf0]  ;;  %v3250_v40 = vld [vmem:[%s5006_s5 + $0x44] sm:$0xf]  ;;  %v3244_v62 = vld [vmem:[%s5006_s5 + $0x14] sm:$0xf]  ;;  %v2823_v30 = vor.u32 %v3296_v22, %v2822_v21 }
  0xcd   :  { %v2651_v42 = vor.u32 %v3251_v39, %v2650_v38  ;;  %v3246_v55 = vld [vmem:[%s5006_s5 + $0x24] sm:$0xf]  ;;  %v3349_v38 = vld [vmem:[%s5008_s7 + $0x2dc] sm:$0xf]  ;;  %v3324_v22 = vld [vmem:[%s5008_s7 + $0x210] sm:$0xf0] }
  0xce   :  { %v749_v46 = vadd.f32 %v748_v41, %v735_v43  ;;  %v2652_v41 = vld [vmem:[%s5006_s5 + $0x48] sm:$0xf0]  ;;  %v3286_v39 = vld [vmem:[%s5008_s7 + $0xe4] sm:$0xf] }
  0xcf   :  { %v2655_v43 = vor.u32 %v3250_v40, %v2652_v41  ;;  %1123 = vmatpush.bf16.msra.mxu0 %v2651_v42  ;;  %v2796_v40 = vld [vmem:[%s5008_s7 + $0xfc] sm:$0xf0]  ;;  %v3048_v41 = vld [vmem:[%s5008_s7 + $0x2f4] sm:$0xf0] }
  0xd0   :  { %v851_v49 = vmax.f32 %v749_v46, 0.0  ;;  %v762_v58 = vpop.f32.mrf.mxu3  ;;  %1136 = vmatpush.bf16.msra.mxu2 %v2663_v36  ;;  %v3249_v46 = vld [vmem:[%s5006_s5 + $0x34] sm:$0xf0]  ;;  %v3352_v36 = vld [vmem:[%s5008_s7 + $0x2f0] sm:$0xf0]  ;;  %v2799_v52 = vor.u32 %v3286_v39, %v2796_v40  ;;  %v2939_v40 = vor.u32 %v3321_v23, %v2936_v24 }
  0xd1   :  { %v763_v2 = vadd.f32 %v762_v58, %v156_v57  ;;  %v2636_v57 = vld [vmem:[%s5006_s5 + $0x28] sm:$0xf0]  ;;  %v3047_v42 = vor.u32 %v3352_v36, %v3046_v35  ;;  %v2888_v39 = vld [vmem:[%s5008_s7 + $0x1ac] sm:$0xf0]  ;;  %v3056_v23 = vld [vmem:[%s5008_s7 + $0x2fc] sm:$0xf0] }
  0xd2   :  { %v853_v51 = vpack.c.bf16 %v851_v49, %v849_v47  ;;  %v3248_v47 = vld [vmem:[%s5006_s5 + $0x34] sm:$0xf]  ;;  %v2643_v49 = vor.u32 %v3249_v46, %v2642_v45  ;;  %v2639_v58 = vor.u32 %v3246_v55, %v2636_v57  ;;  %v3018_v45 = vld [vmem:[%s5008_s7 + $0x2a0] sm:$0xf]  ;;  %v3282_v55 = vld [vmem:[%s5008_s7 + $0xc0] sm:$0xf0] }
  0xd3   :  { %v776_v61 = vpop.f32.mrf.mxu2  ;;  %v2768_v57 = vld [vmem:[%s5008_s7 + $0xc4] sm:$0xf0] }
  0xd4   :  { %995 = vmatmul.bf16.vlgmr.msrb.gmra.mxu1 %v853_v51  ;;  %v777_v7 = vadd.f32 %v776_v61, %v763_v2  ;;  %1137 = vmatpush.bf16.msra.mxu2 %v2655_v43  ;;  %v2647_v51 = vor.u32 %v3248_v47, %v2644_v50  ;;  %v3245_v61 = vld [vmem:[%s5006_s5 + $0x14] sm:$0xf0]  ;;  %v3051_v43 = vor.u32 %v3349_v38, %v3048_v41  ;;  %v3342_v50 = vld [vmem:[%s5008_s7 + $0x2a4] sm:$0xf]  ;;  %v3308_v38 = vld [vmem:[%s5008_s7 + $0x194] sm:$0xf] }
  0xd5   :  { %1124 = vmatpush.bf16.msra.mxu0 %v2643_v49  ;;  %v2795_v47 = vor.u32 %v3289_v33, %v2794_v32  ;;  %v3345_v49 = vld [vmem:[%s5008_s7 + $0x2b8] sm:$0xf0]  ;;  %v2684_v32 = vld [vmem:[%s5008_s7 + $0x1c] sm:$0xf0]  ;;  %v2886_v33 = vld [vmem:[%s5008_s7 + $0x190] sm:$0xf] }
  0xd6   :  { %v2906_v41 = vld [vmem:[%s5008_s7 + $0x1c0] sm:$0xf] }
  0xd8   :  { %1138 = vmatpush.bf16.msra.mxu2 %v2647_v51  ;;  %v3020_v51 = vld [vmem:[%s5008_s7 + $0x2bc] sm:$0xf0] }
  0xd9   :  { %1125 = vmatpush.bf16.msra.mxu0 %v2635_v56  ;;  %v3279_v56 = vld [vmem:[%s5008_s7 + $0xac] sm:$0xf] }
  0xdc   :  { %1139 = vmatpush.bf16.msra.mxu2 %v2639_v58  ;;  %v3019_v58 = vor.u32 %v3345_v49, %v3018_v45  ;;  %v3314_v45 = vld [vmem:[%s5008_s7 + $0x1c4] sm:$0xf] }
  0xe0   :  { %v788_v59 = vpop.f32.mrf.mxu0 }
  0xe1   :  { %v789_v8 = vadd.f32 %v788_v59, %v775_v1  ;;  %v2626_v59 = vld [vmem:[%s5006_s5 + $0x10] sm:$0xf]  ;;  %v2628_v1 = vld [vmem:[%s5006_s5 + $0x18] sm:$0xf0] }
  0xe2   :  { %v2631_v2 = vor.u32 %v3244_v62, %v2628_v1  ;;  %v2767_v62 = vor.u32 %v3282_v55, %v2766_v53  ;;  %v3335_v1 = vld [vmem:[%s5008_s7 + $0x26c] sm:$0xf]  ;;  %v3364_v55 = vld [vmem:[%s5008_s7 + $0x354] sm:$0xf] }
  0xe3   :  { %v802_v0 = vpop.f32.mrf.mxu1 }
  0xe4   :  { %v803_v54 = vadd.f32 %v802_v0, %v789_v8  ;;  %v2627_v0 = vor.u32 %v3245_v61, %v2626_v59  ;;  %1140 = vmatpush.bf16.msra.mxu2 %v2631_v2  ;;  %v2620_v8 = vld [vmem:[%s5006_s5 + $0x8] sm:$0xf0]  ;;  %v3023_v59 = vor.u32 %v3342_v50, %v3020_v51  ;;  %v2990_v61 = vld [vmem:[%s5008_s7 + $0x268] sm:$0xf]  ;;  %v3110_v50 = vld [vmem:[%s5008_s7 + $0x350] sm:$0xf] }
  0xe5   :  { %v2992_v2 = vld [vmem:[%s5008_s7 + $0x284] sm:$0xf0]  ;;  %v3367_v51 = vld [vmem:[%s5008_s7 + $0x368] sm:$0xf0] }
  0xe6   :  { %1126 = vmatpush.bf16.msra.mxu0 %v2627_v0  ;;  %v3338_v0 = vld [vmem:[%s5008_s7 + $0x280] sm:$0xf0] }
  0xe8   :  { %v816_v3 = vpop.f32.mrf.mxu3  ;;  %v790_v5 = vpop.f32.mrf.mxu0 }
  0xe9   :  { %v791_v9 = vadd.f32 %v790_v5, %v777_v7  ;;  %v817_v37 = vadd.f32 %v816_v3, %v803_v54  ;;  %v2618_v3 = vld [vmem:[%s5006_s5] sm:$0xf]  ;;  %v3243_v5 = vld [vmem:[%s5006_s5 + $0x4] sm:$0xf0]  ;;  %v3310_v54 = vld [vmem:[%s5008_s7 + $0x1a0] sm:$0xf0] }
  0xea   :  { %v2619_v7 = vor.u32 %v3243_v5, %v2618_v3  ;;  %v2771_v3 = vor.u32 %v3279_v56, %v2768_v57  ;;  %v2738_v5 = vld [vmem:[%s5008_s7 + $0x70] sm:$0xf] }
  0xeb   :  { %v830_v6 = vpop.f32.mrf.mxu2  ;;  %v804_v4 = vpop.f32.mrf.mxu1  ;;  %v3112_v56 = vld [vmem:[%s5008_s7 + $0x36c] sm:$0xf0] }
  0xec   :  { %v805_v44 = vadd.f32 %v804_v4, %v791_v9  ;;  %v831_v60 = vadd.f32 %v830_v6, %v817_v37  ;;  %v3242_v6 = vld [vmem:[%s5006_s5 + $0x4] sm:$0xf]  ;;  %1127 = vmatpush.bf16.msra.mxu0 %v2619_v7  ;;  %v2878_v4 = vld [vmem:[%s5008_s7 + $0x188] sm:$0xf] }
  0xed   :  { %v2623_v9 = vor.u32 %v3242_v6, %v2620_v8  ;;  %v2880_v37 = vld [vmem:[%s5008_s7 + $0x1a4] sm:$0xf0]  ;;  %v3275_v6 = vld [vmem:[%s5008_s7 + $0x88] sm:$0xf0]  ;;  %v3272_v8 = vld [vmem:[%s5008_s7 + $0x74] sm:$0xf] }
  0xef   :  { %1141 = vmatpush.bf16.msra.mxu2 %v2623_v9  ;;  %v2740_v9 = vld [vmem:[%s5008_s7 + $0x8c] sm:$0xf0] }
  0xf0   :  { %v818_v63 = vpop.f32.mrf.mxu3  ;;  %v844_v48 = vpop.f32.mrf.mxu0 }
  0xf1   :  { %v819_v10 = vadd.f32 %v818_v63, %v805_v44  ;;  %v845_v12 = vadd.f32 %v844_v48, %v831_v60  ;;  %v3307_v63 = vld [vmem:[%s5008_s7 + $0x18c] sm:$0xf]  ;;  %v2879_v48 = vor.u32 %v3310_v54, %v2878_v4  ;;  %v2850_v44 = vld [vmem:[%s5008_s7 + $0x150] sm:$0xf]  ;;  %v3300_v60 = vld [vmem:[%s5008_s7 + $0x154] sm:$0xf]  ;;  %v2991_v54 = vor.u32 %v3338_v0, %v2990_v61 }
  0xf2   :  { %v3373_v4 = vld [vmem:[%s5005_s4] ss:$0 sm:$0xff]  ;;  %v3304_v61 = vld [vmem:[%s5008_s7 + $0x170] sm:$0xf0]  ;;  %v3301_v0 = vld [vmem:[%s5008_s7 + $0x15c] sm:$0xf] }
  0xf3   :  { %v832_v11 = vpop.f32.mrf.mxu2  ;;  %v850_v16 = vmax.f32 %v845_v12, 0.0  ;;  %v2852_v12 = vld [vmem:[%s5008_s7 + $0x16c] sm:$0xf0]  ;;  %1874 = vmatpush.bf16.msra.mxu1 %v2879_v48 }
  0xf4   :  { %v833_v13 = vadd.f32 %v832_v11, %v819_v10  ;;  %v3303_v10 = vld [vmem:[%s5008_s7 + $0x168] sm:$0xf0]  ;;  %v2883_v11 = vor.u32 %v3307_v63, %v2880_v37  ;;  %v2995_v63 = vor.u32 %v3335_v1, %v2992_v2  ;;  %v2962_v48 = vld [vmem:[%s5008_s7 + $0x230] sm:$0xf]  ;;  %v2739_v37 = vor.u32 %v3275_v6, %v2738_v5  ;;  %v2860_v1 = vld [vmem:[%s5008_s7 + $0x174] sm:$0xf0] }
  0xf5   :  { %v3115_v5 = vor.u32 %v3364_v55, %v3112_v56  ;;  %v3082_v6 = vld [vmem:[%s5008_s7 + $0x318] sm:$0xf]  ;;  %v3266_v56 = vld [vmem:[%s5008_s7 + $0x44] sm:$0xf] }
  0xf6   :  { %1902 = vmatpush.bf16.msrb.mxu0 %v2883_v11  ;;  %v2964_v11 = vld [vmem:[%s5008_s7 + $0x24c] sm:$0xf0] }
  0xf8   :  { %v846_v14 = vpop.f32.mrf.mxu0 }
  0xf9   :  { %v847_v15 = vadd.f32 %v846_v14, %v833_v13  ;;  %v3102_v13 = vld [vmem:[%s5008_s7 + $0x348] sm:$0xf]  ;;  %v2851_v14 = vor.u32 %v3303_v10, %v2850_v44  ;;  %v3331_v44 = vld [vmem:[%s5008_s7 + $0x248] sm:$0xf0]  ;;  %v3328_v10 = vld [vmem:[%s5008_s7 + $0x234] sm:$0xf] }
  0xfb   :  { %v852_v17 = vmax.f32 %v847_v15, 0.0  ;;  %v3366_v15 = vld [vmem:[%s5008_s7 + $0x360] sm:$0xf0]  ;;  %1875 = vmatpush.bf16.msra.mxu1 %v2851_v14 }
  0xfc   :  { %v3103_v19 = vor.u32 %v3366_v15, %v3102_v13  ;;  %v3268_v13 = vld [vmem:[%s5008_s7 + $0x50] sm:$0xf0]  ;;  %v3265_v15 = vld [vmem:[%s5008_s7 + $0x3c] sm:$0xf] }
  0xfd   :  { %v854_v18 = vpack.c.bf16 %v852_v17, %v850_v16  ;;  %v3363_v16 = vld [vmem:[%s5008_s7 + $0x34c] sm:$0xf]  ;;  %v3104_v17 = vld [vmem:[%s5008_s7 + $0x364] sm:$0xf0] }
  0xfe   :  { %v3107_v20 = vor.u32 %v3363_v16, %v3104_v17  ;;  %1888 = vmatpush.bf16.msra.mxu3 %v3103_v19  ;;  %v2712_v16 = vld [vmem:[%s5008_s7 + $0x54] sm:$0xf0]  ;;  %v2967_v19 = vor.u32 %v3328_v10, %v2964_v11 }
  0xff   :  { %1009 = vmatmul.bf16.vlgmr.msrb.gmra.mxu3 %v854_v18  ;;  %v2855_v18 = vor.u32 %v3300_v60, %v2852_v12  ;;  %1876 = vmatpush.bf16.msra.mxu1 %v2823_v30  ;;  %v2743_v60 = vor.u32 %v3272_v8, %v2740_v9  ;;  %v2710_v12 = vld [vmem:[%s5008_s7 + $0x38] sm:$0xf]  ;;  %v3258_v30 = vld [vmem:[%s5008_s7 + $0x4] sm:$0xf]  ;;  %v3357_v9 = vld [vmem:[%s5008_s7 + $0x31c] sm:$0xf] }
 0x100   :  { %1916 = vmatpush.bf16.msrb.mxu2 %v3107_v20  ;;  %v2934_v20 = vld [vmem:[%s5008_s7 + $0x1f8] sm:$0xf]  ;;  %v2711_v21 = vor.u32 %v3268_v13, %v2710_v12  ;;  %v2802_v13 = vld [vmem:[%s5008_s7 + $0xe8] sm:$0xf] }
 0x101   :  { %1903 = vmatpush.bf16.msrb.mxu0 %v2855_v18  ;;  %v2963_v18 = vor.u32 %v3331_v44, %v2962_v48  ;;  %v2935_v36 = vor.u32 %v3324_v22, %v2934_v20  ;;  %v3297_v48 = vld [vmem:[%s5008_s7 + $0x138] sm:$0xf0]  ;;  %v2832_v44 = vld [vmem:[%s5008_s7 + $0x13c] sm:$0xf0]  ;;  %v3350_v22 = vld [vmem:[%s5008_s7 + $0x2e4] sm:$0xf] }
 0x102   :  { %1889 = vmatpush.bf16.msra.mxu3 %v3075_v27  ;;  %v2715_v27 = vor.u32 %v3265_v15, %v2712_v16  ;;  %v3287_v15 = vld [vmem:[%s5008_s7 + $0xec] sm:$0xf]  ;;  %v2804_v16 = vld [vmem:[%s5008_s7 + $0x104] sm:$0xf0]  ;;  %v3353_v20 = vld [vmem:[%s5008_s7 + $0x2f8] sm:$0xf0]  ;;  %v3059_v24 = vor.u32 %v3350_v22, %v3056_v23 }
 0x103   :  { %1877 = vmatpush.bf16.msra.mxu1 %v2795_v47  ;;  %v2894_v22 = vld [vmem:[%s5008_s7 + $0x198] sm:$0xf] }
 0x104   :  { %1917 = vmatpush.bf16.msrb.mxu2 %v3079_v31 }
 0x105   :  { %1904 = vmatpush.bf16.msrb.mxu0 %v2827_v34  ;;  %v3311_v34 = vld [vmem:[%s5008_s7 + $0x1a8] sm:$0xf0] }
 0x106   :  { %1890 = vmatpush.bf16.msra.mxu3 %v3047_v42  ;;  %v2683_v42 = vor.u32 %v3261_v29, %v2682_v28  ;;  %v2887_v53 = vor.u32 %v3311_v34, %v2886_v33  ;;  %v3280_v28 = vld [vmem:[%s5008_s7 + $0xb4] sm:$0xf]  ;;  %v2776_v29 = vld [vmem:[%s5008_s7 + $0xcc] sm:$0xf0]  ;;  %v3343_v34 = vld [vmem:[%s5008_s7 + $0x2ac] sm:$0xf] }
 0x107   :  { %1878 = vmatpush.bf16.msra.mxu1 %v2767_v62 }
 0x108   :  { %1918 = vmatpush.bf16.msrb.mxu2 %v3051_v43  ;;  %v3317_v43 = vld [vmem:[%s5008_s7 + $0x1d8] sm:$0xf0] }
 0x109   :  { %1905 = vmatpush.bf16.msrb.mxu0 %v2799_v52  ;;  %v2687_v52 = vor.u32 %v3258_v30, %v2684_v32  ;;  %v2907_v62 = vor.u32 %v3317_v43, %v2906_v41  ;;  %v2779_v30 = vor.u32 %v3280_v28, %v2776_v29  ;;  %v3346_v32 = vld [vmem:[%s5008_s7 + $0x2c0] sm:$0xf0]  ;;  %v3273_v41 = vld [vmem:[%s5008_s7 + $0x7c] sm:$0xf] }
 0x10a   :  { %1891 = vmatpush.bf16.msra.mxu3 %v3019_v58  ;;  %v2891_v58 = vor.u32 %v3308_v38, %v2888_v39  ;;  %v2746_v38 = vld [vmem:[%s5008_s7 + $0x78] sm:$0xf]  ;;  %v3276_v39 = vld [vmem:[%s5008_s7 + $0x90] sm:$0xf0] }
 0x10b   :  { %1879 = vmatpush.bf16.msra.mxu1 %v2739_v37  ;;  %v3294_v37 = vld [vmem:[%s5008_s7 + $0x124] sm:$0xf] }
 0x10c   :  { %1919 = vmatpush.bf16.msrb.mxu2 %v3023_v59  ;;  %v2858_v59 = vld [vmem:[%s5008_s7 + $0x158] sm:$0xf]  ;;  %v2835_v12 = vor.u32 %v3294_v37, %v2832_v44  ;;  %v2944_v37 = vld [vmem:[%s5008_s7 + $0x21c] sm:$0xf0] }
 0x10d   :  { %1906 = vmatpush.bf16.msrb.mxu0 %v2771_v3  ;;  %v3111_v3 = vor.u32 %v3367_v51, %v3110_v50  ;;  %v2859_v8 = vor.u32 %v3304_v61, %v2858_v59  ;;  %v3000_v50 = vld [vmem:[%s5008_s7 + $0x28c] sm:$0xf0]  ;;  %v2970_v59 = vld [vmem:[%s5008_s7 + $0x238] sm:$0xf]  ;;  %v3332_v61 = vld [vmem:[%s5008_s7 + $0x250] sm:$0xf0] }
 0x10e   :  { %1892 = vmatpush.bf16.msra.mxu3 %v2991_v54  ;;  %v2863_v54 = vor.u32 %v3301_v0, %v2860_v1  ;;  %v3329_v0 = vld [vmem:[%s5008_s7 + $0x23c] sm:$0xf]  ;;  %v2972_v1 = vld [vmem:[%s5008_s7 + $0x254] sm:$0xf0] }
 0x10f   :  { %1880 = vmatpush.bf16.msra.mxu1 %v2711_v21 }
 0x110   :  { %1920 = vmatpush.bf16.msrb.mxu2 %v2995_v63  ;;  %v2830_v63 = vld [vmem:[%s5008_s7 + $0x120] sm:$0xf] }
 0x111   :  { %1907 = vmatpush.bf16.msrb.mxu0 %v2743_v60  ;;  %v2831_v60 = vor.u32 %v3297_v48, %v2830_v63  ;;  %v3322_v48 = vld [vmem:[%s5008_s7 + $0x204] sm:$0xf] }
 0x112   :  { %1893 = vmatpush.bf16.msra.mxu3 %v2963_v18  ;;  %v2807_v18 = vor.u32 %v3287_v15, %v2804_v16  ;;  %v2947_v44 = vor.u32 %v3322_v48, %v2944_v37  ;;  %v1034_v15 = vld [vmem:[%s5007_s6] sm:$0x3] }
 0x113   :  { %1881 = vmatpush.bf16.msra.mxu1 %v2683_v42  ;;  %v2748_v42 = vld [vmem:[%s5008_s7 + $0x94] sm:$0xf0] }
 0x114   :  { %1921 = vmatpush.bf16.msrb.mxu2 %v2967_v19  ;;  %v3054_v19 = vld [vmem:[%s5008_s7 + $0x2e0] sm:$0xf]  ;;  %v2751_v43 = vor.u32 %v3273_v41, %v2748_v42  ;;  %v3368_v41 = vld [vmem:[%s5008_s7 + $0x370] sm:$0xf0]  ;;  %v3365_v42 = vld [vmem:[%s5008_s7 + $0x35c] sm:$0xf] }
 0x115   :  { %1908 = vmatpush.bf16.msrb.mxu0 %v2715_v27  ;;  %v3055_v21 = vor.u32 %v3353_v20, %v3054_v19  ;;  %v1037_v20 = vperm.slane %v1034_v15, 1 }
 0x116   :  { %1894 = vmatpush.bf16.msra.mxu3 %v2935_v36 }
 0x117   :  { %1930 = vmatpush.bf16.msrb.mxu1 %v2887_v53  ;;  %v3269_v53 = vld [vmem:[%s5008_s7 + $0x58] sm:$0xf0] }
 0x118   :  { %1922 = vmatpush.bf16.msrb.mxu2 %v2939_v40  ;;  %v2747_v40 = vor.u32 %v3276_v39, %v2746_v38  ;;  %v3118_v39 = vld [vmem:[%s5008_s7 + $0x358] sm:$0xf] }
 0x119   :  { %1909 = vmatpush.bf16.msrb.mxu0 %v2687_v52  ;;  %v2718_v52 = vld [vmem:[%s5008_s7 + $0x40] sm:$0xf] }
 0x11a   :  { %1895 = vmatpush.bf16.msra.mxu3 %v2907_v62  ;;  %v2719_v55 = vor.u32 %v3269_v53, %v2718_v52  ;;  %v2971_v62 = vor.u32 %v3332_v61, %v2970_v59  ;;  %v3295_v52 = vld [vmem:[%s5008_s7 + $0x12c] sm:$0xf]  ;;  %v2840_v53 = vld [vmem:[%s5008_s7 + $0x144] sm:$0xf0]  ;;  %v3361_v59 = vld [vmem:[%s5008_s7 + $0x338] sm:$0xf0] }
 0x11b   :  { %1931 = vmatpush.bf16.msrb.mxu1 %v2859_v8  ;;  %v2692_v8 = vld [vmem:[%s5008_s7 + $0x24] sm:$0xf0]  ;;  %v3358_v61 = vld [vmem:[%s5008_s7 + $0x324] sm:$0xf] }
 0x11e   :  { %1944 = vmatpush.bf16.msrb.mxu3 %v3111_v3  ;;  %v2690_v3 = vld [vmem:[%s5008_s7 + $0x8] sm:$0xf] }
 0x11f   :  { %1932 = vmatpush.bf16.msrb.mxu1 %v2831_v60 }
 0x151   :  { %v996_v46 = vpop.f32.mrf.mxu1 }
 0x152   :  { %v997_v17 = vadd.f32 %v3373_v4, %v996_v46  ;;  %v2908_v46 = vld [vmem:[%s5008_s7 + $0x1dc] sm:$0xf0] }
 0x153   :  { %v2911_v2 = vor.u32 %v3314_v45, %v2908_v46  ;;  %v2998_v45 = vld [vmem:[%s5008_s7 + $0x270] sm:$0xf]  ;;  %v3339_v46 = vld [vmem:[%s5008_s7 + $0x288] sm:$0xf0] }
 0x155   :  { %1923 = vmatpush.bf16.msrb.mxu2 %v2911_v2  ;;  %v2975_v2 = vor.u32 %v3329_v0, %v2972_v1  ;;  %v2843_v1 = vor.u32 %v3295_v52, %v2840_v53 }
 0x159   :  { %v998_v14 = vpop.f32.mrf.mxu1 }
 0x15a   :  { %v999_v25 = vadd.f32 %v3373_v4, %v998_v14  ;;  %v3084_v4 = vld [vmem:[%s5008_s7 + $0x334] sm:$0xf0]  ;;  %v3290_v14 = vld [vmem:[%s5008_s7 + $0x100] sm:$0xf0] }
 0x15b   :  { %v3087_v11 = vor.u32 %v3357_v9, %v3084_v4  ;;  %v2942_v4 = vld [vmem:[%s5008_s7 + $0x200] sm:$0xf] }
 0x182   :  { %v1010_v7 = vpop.f32.mrf.mxu3 }
 0x183   :  { %v1011_v26 = vadd.f32 %v1010_v7, %v997_v17  ;;  %v3360_v7 = vld [vmem:[%s5008_s7 + $0x330] sm:$0xf0]  ;;  %v2803_v17 = vor.u32 %v3290_v14, %v2802_v13  ;;  %v2916_v13 = vld [vmem:[%s5008_s7 + $0x1e4] sm:$0xf0] }
 0x184   :  { %v3083_v10 = vor.u32 %v3360_v7, %v3082_v6  ;;  %v3259_v7 = vld [vmem:[%s5008_s7 + $0xc] sm:$0xf] }
 0x185   :  { %v1015_v47 = vmax.f32 %v1011_v26, 0.0  ;;  %1933 = vmatpush.bf16.msrb.mxu1 %v2803_v17  ;;  %v3283_v26 = vld [vmem:[%s5008_s7 + $0xc8] sm:$0xf0]  ;;  %v2695_v9 = vor.u32 %v3259_v7, %v2692_v8  ;;  %v1036_v17 = vperm.slane %v1034_v15, 0 }
 0x186   :  { %1945 = vmatpush.bf16.msrb.mxu3 %v3083_v10  ;;  %v2914_v10 = vld [vmem:[%s5008_s7 + $0x1c8] sm:$0xf]  ;;  %v3347_v15 = vld [vmem:[%s5008_s7 + $0x2c8] sm:$0xf0] }
 0x18a   :  { %v1012_v31 = vpop.f32.mrf.mxu3  ;;  %1946 = vmatpush.bf16.msrb.mxu3 %v3055_v21 }
 0x18b   :  { %v1013_v35 = vadd.f32 %v1012_v31, %v999_v25  ;;  %v2774_v25 = vld [vmem:[%s5008_s7 + $0xb0] sm:$0xf]  ;;  %v3026_v31 = vld [vmem:[%s5008_s7 + $0x2a8] sm:$0xf] }
 0x18c   :  { %v2775_v27 = vor.u32 %v3283_v26, %v2774_v25  ;;  %v3027_v33 = vor.u32 %v3346_v32, %v3026_v31  ;;  %v3309_v25 = vld [vmem:[%s5008_s7 + $0x19c] sm:$0xf]  ;;  %v2896_v26 = vld [vmem:[%s5008_s7 + $0x1b4] sm:$0xf0]  ;;  %v2866_v31 = vld [vmem:[%s5008_s7 + $0x160] sm:$0xf] }
 0x18d   :  { %v1016_v49 = vmax.f32 %v1013_v35, 0.0  ;;  %v3028_v35 = vld [vmem:[%s5008_s7 + $0x2c4] sm:$0xf0] }
 0x18e   :  { %1934 = vmatpush.bf16.msrb.mxu1 %v2775_v27  ;;  %v3031_v36 = vor.u32 %v3343_v34, %v3028_v35  ;;  %1947 = vmatpush.bf16.msrb.mxu3 %v3027_v33  ;;  %v3305_v34 = vld [vmem:[%s5008_s7 + $0x178] sm:$0xf0]  ;;  %v3302_v35 = vld [vmem:[%s5008_s7 + $0x164] sm:$0xf] }
 0x18f   :  { %v1017_v57 = vpack.c.bf16 %v1016_v49, %v1015_v47  ;;  %v2999_v47 = vor.u32 %v3339_v46, %v2998_v45  ;;  %v3336_v49 = vld [vmem:[%s5008_s7 + $0x274] sm:$0xf]  ;;  %v2867_v45 = vor.u32 %v3305_v34, %v2866_v31  ;;  %v3270_v34 = vld [vmem:[%s5008_s7 + $0x60] sm:$0xf0] }
 0x190   :  { %v3003_v51 = vor.u32 %v3336_v49, %v3000_v50  ;;  %v3298_v49 = vld [vmem:[%s5008_s7 + $0x140] sm:$0xf0] }
 0x191   :  { %1128 = vmatmul.bf16.vlgmr.msra.gmra.mxu0 %v1017_v57  ;;  %1142 = vmatmul.bf16.vlgmr.msra.gmra.mxu2 %v1017_v57  ;;  %v2720_v57 = vld [vmem:[%s5008_s7 + $0x5c] sm:$0xf0] }
 0x192   :  { %1958 = vmatpush.bf16.msra.mxu0 %v2891_v58  ;;  %1972 = vmatpush.bf16.msra.mxu2 %v3115_v5  ;;  %v2723_v58 = vor.u32 %v3266_v56, %v2720_v57  ;;  %v3262_v5 = vld [vmem:[%s5008_s7 + $0x20] sm:$0xf0]  ;;  %v3090_v57 = vld [vmem:[%s5008_s7 + $0x320] sm:$0xf] }
 0x193   :  { %1935 = vmatpush.bf16.msrb.mxu1 %v2747_v40  ;;  %1948 = vmatpush.bf16.msrb.mxu3 %v2999_v47  ;;  %v2691_v6 = vor.u32 %v3262_v5, %v2690_v3  ;;  %v2838_v47 = vld [vmem:[%s5008_s7 + $0x128] sm:$0xf]  ;;  %v3291_v3 = vld [vmem:[%s5008_s7 + $0x108] sm:$0xf0]  ;;  %v3288_v5 = vld [vmem:[%s5008_s7 + $0xf4] sm:$0xf]  ;;  %v3091_v7 = vor.u32 %v3361_v59, %v3090_v57 }
 0x194   :  { %v2839_v0 = vor.u32 %v3298_v49, %v2838_v47  ;;  %v2698_v47 = vld [vmem:[%s5008_s7 + $0x10] sm:$0xf]  ;;  %v3263_v49 = vld [vmem:[%s5008_s7 + $0x28] sm:$0xf0]  ;;  %v2950_v57 = vld [vmem:[%s5008_s7 + $0x208] sm:$0xf] }
 0x195   :  { %v3326_v59 = vld [vmem:[%s5008_s7 + $0x220] sm:$0xf0] }
 0x196   :  { %1959 = vmatpush.bf16.msra.mxu0 %v2863_v54  ;;  %1973 = vmatpush.bf16.msra.mxu2 %v3087_v11  ;;  %v3325_v54 = vld [vmem:[%s5008_s7 + $0x218] sm:$0xf0]  ;;  %v3318_v11 = vld [vmem:[%s5008_s7 + $0x1e0] sm:$0xf0] }
 0x197   :  { %1936 = vmatpush.bf16.msrb.mxu1 %v2719_v55  ;;  %1949 = vmatpush.bf16.msrb.mxu3 %v2971_v62  ;;  %v2943_v63 = vor.u32 %v3325_v54, %v2942_v4  ;;  %v2915_v60 = vor.u32 %v3318_v11, %v2914_v10  ;;  %v3119_v55 = vor.u32 %v3368_v41, %v3118_v39  ;;  %v3092_v62 = vld [vmem:[%s5008_s7 + $0x33c] sm:$0xf0]  ;;  %v3354_v4 = vld [vmem:[%s5008_s7 + $0x300] sm:$0xf0]  ;;  %v3351_v54 = vld [vmem:[%s5008_s7 + $0x2ec] sm:$0xf] }
 0x198   :  { %v3095_v8 = vor.u32 %v3358_v61, %v3092_v62  ;;  %v3284_v10 = vld [vmem:[%s5008_s7 + $0xd0] sm:$0xf0]  ;;  %v3281_v11 = vld [vmem:[%s5008_s7 + $0xbc] sm:$0xf]  ;;  %v3323_v61 = vld [vmem:[%s5008_s7 + $0x20c] sm:$0xf] }
 0x199   :  { %v3333_v41 = vld [vmem:[%s5008_s7 + $0x258] sm:$0xf0]  ;;  %v2952_v62 = vld [vmem:[%s5008_s7 + $0x224] sm:$0xf0] }
 0x19a   :  { %1960 = vmatpush.bf16.msra.mxu0 %v2835_v12  ;;  %1974 = vmatpush.bf16.msra.mxu2 %v3059_v24  ;;  %v3315_v12 = vld [vmem:[%s5008_s7 + $0x1cc] sm:$0xf]  ;;  %v3312_v24 = vld [vmem:[%s5008_s7 + $0x1b0] sm:$0xf0] }
 0x19b   :  { %1937 = vmatpush.bf16.msrb.mxu1 %v2691_v6  ;;  %1950 = vmatpush.bf16.msrb.mxu3 %v2943_v63  ;;  %v2919_v14 = vor.u32 %v3315_v12, %v2916_v13  ;;  %v2895_v29 = vor.u32 %v3312_v24, %v2894_v22  ;;  %v2812_v6 = vld [vmem:[%s5008_s7 + $0x10c] sm:$0xf0]  ;;  %v3064_v63 = vld [vmem:[%s5008_s7 + $0x304] sm:$0xf0]  ;;  %v3274_v22 = vld [vmem:[%s5008_s7 + $0x84] sm:$0xf] }
 0x19c   :  { %v2815_v37 = vor.u32 %v3288_v5, %v2812_v6  ;;  %v3067_v13 = vor.u32 %v3351_v54, %v3064_v63  ;;  %v2955_v5 = vor.u32 %v3323_v61, %v2952_v62  ;;  %v2874_v6 = vld [vmem:[%s5008_s7 + $0x168] sm:$0xf]  ;;  %v2924_v54 = vld [vmem:[%s5008_s7 + $0x1ec] sm:$0xf0]  ;;  %v3126_v63 = vld [vmem:[%s5008_s7 + $0x360] sm:$0xf] }
 0x19e   :  { %1961 = vmatpush.bf16.msra.mxu0 %v2807_v18  ;;  %1975 = vmatpush.bf16.msra.mxu2 %v3031_v36  ;;  %v2868_v36 = vld [vmem:[%s5008_s7 + $0x17c] sm:$0xf0] }
 0x19f   :  { %1951 = vmatpush.bf16.msrb.mxu3 %v2915_v60  ;;  %v2871_v46 = vor.u32 %v3302_v35, %v2868_v36  ;;  %v2784_v60 = vld [vmem:[%s5008_s7 + $0xd4] sm:$0xf0]  ;;  %v3267_v35 = vld [vmem:[%s5008_s7 + $0x4c] sm:$0xf]  ;;  %v2728_v36 = vld [vmem:[%s5008_s7 + $0x64] sm:$0xf0] }
 0x1a2   :  { %1962 = vmatpush.bf16.msra.mxu0 %v2779_v30  ;;  %1976 = vmatpush.bf16.msra.mxu2 %v3003_v51  ;;  %v2899_v30 = vor.u32 %v3309_v25, %v2896_v26  ;;  %v3006_v26 = vld [vmem:[%s5008_s7 + $0x278] sm:$0xf] }
 0x1a6   :  { %1963 = vmatpush.bf16.msra.mxu0 %v2751_v43  ;;  %1977 = vmatpush.bf16.msra.mxu2 %v2975_v2  ;;  %v3120_v43 = vld [vmem:[%s5008_s7 + $0x374] sm:$0xf0]  ;;  %v2810_v2 = vld [vmem:[%s5008_s7 + $0xf0] sm:$0xf] }
 0x1a7   :  { %v3123_v56 = vor.u32 %v3365_v42, %v3120_v43  ;;  %v2811_v48 = vor.u32 %v3291_v3, %v2810_v2  ;;  %v3330_v42 = vld [vmem:[%s5008_s7 + $0x244] sm:$0xf]  ;;  %v2980_v43 = vld [vmem:[%s5008_s7 + $0x25c] sm:$0xf0]  ;;  %v2951_v3 = vor.u32 %v3326_v59, %v2950_v57 }
 0x1a8   :  { %v2983_v53 = vor.u32 %v3330_v42, %v2980_v43  ;;  %v2706_v42 = vld [vmem:[%s5008_s7 + $0x18] sm:$0xf]  ;;  %v3264_v43 = vld [vmem:[%s5008_s7 + $0x30] sm:$0xf0]  ;;  %v4987_v57 = vld [vmem:[%s5009_s8] sm:$0x7f] }
 0x1a9   :  { %v1284_v59 = vperm.slane %v4987_v57, 0  ;;  %v1285_v61 = vperm.slane %v4987_v57, 1 }
 0x1aa   :  { %1964 = vmatpush.bf16.msra.mxu0 %v2723_v58  ;;  %1978 = vmatpush.bf16.msra.mxu2 %v2947_v44  ;;  %v2782_v44 = vld [vmem:[%s5008_s7 + $0xb8] sm:$0xf] }
 0x1ae   :  { %1965 = vmatpush.bf16.msra.mxu0 %v2695_v9  ;;  %1979 = vmatpush.bf16.msra.mxu2 %v2919_v14  ;;  %v3062_v9 = vld [vmem:[%s5008_s7 + $0x2e8] sm:$0xf]  ;;  %v3034_v14 = vld [vmem:[%s5008_s7 + $0x2b0] sm:$0xf] }
 0x1af   :  { %v3063_v12 = vor.u32 %v3354_v4, %v3062_v9  ;;  %v3035_v24 = vor.u32 %v3347_v15, %v3034_v14  ;;  %v3319_v9 = vld [vmem:[%s5008_s7 + $0x1e8] sm:$0xf0]  ;;  %v3316_v4 = vld [vmem:[%s5008_s7 + $0x1d4] sm:$0xf]  ;;  %v3362_v14 = vld [vmem:[%s5008_s7 + $0x340] sm:$0xf0] }
 0x20e   :  { %v1129_v16 = vpop.f32.mrf.mxu0 }
 0x20f   :  { %v1130_v19 = vadd.f32 %v1129_v16, %v1036_v17  ;;  %v3344_v16 = vld [vmem:[%s5008_s7 + $0x2b4] sm:$0xf] }
 0x211   :  { %v1148_v27 = vmax.f32 %v1130_v19, 0.0  ;;  %v2787_v19 = vor.u32 %v3281_v11, %v2784_v60  ;;  %v2846_v11 = vld [vmem:[%s5008_s7 + $0x130] sm:$0xf]  ;;  %v3299_v60 = vld [vmem:[%s5008_s7 + $0x148] sm:$0xf0] }
 0x212   :  { %v2847_v15 = vor.u32 %v3299_v60, %v2846_v11  ;;  %v1286_v11 = vperm.slane %v4987_v57, 2  ;;  %v1287_v60 = vperm.slane %v4987_v57, 3 }
 0x214   :  { %v1143_v18 = vpop.f32.mrf.mxu2 }
 0x215   :  { %v1144_v32 = vadd.f32 %v1143_v18, %v1037_v20  ;;  %v2783_v18 = vor.u32 %v3284_v10, %v2782_v44  ;;  %v2927_v10 = vor.u32 %v3316_v4, %v2924_v54 }
 0x216   :  { %v1131_v21 = vpop.f32.mrf.mxu0 }
 0x217   :  { %v1132_v23 = vadd.f32 %v1131_v21, %v1036_v17  ;;  %v1149_v50 = vmax.f32 %v1144_v32, 0.0  ;;  %v3036_v17 = vld [vmem:[%s5008_s7 + $0x2cc] sm:$0xf0]  ;;  %v3277_v21 = vld [vmem:[%s5008_s7 + $0x98] sm:$0xf0] }
 0x218   :  { %v3039_v25 = vor.u32 %v3344_v16, %v3036_v17  ;;  %v2726_v32 = vld [vmem:[%s5008_s7 + $0x48] sm:$0xf]  ;;  %v2818_v16 = vld [vmem:[%s5008_s7 + $0xf8] sm:$0xf]  ;;  %v3292_v17 = vld [vmem:[%s5008_s7 + $0x110] sm:$0xf0] }
 0x219   :  { %v1150_v28 = vmax.f32 %v1132_v23, 0.0  ;;  %v2756_v23 = vld [vmem:[%s5008_s7 + $0x9c] sm:$0xf0] }
 0x21a   :  { %v2759_v31 = vor.u32 %v3274_v22, %v2756_v23  ;;  %v2790_v22 = vld [vmem:[%s5008_s7 + $0xc0] sm:$0xf]  ;;  %v3285_v23 = vld [vmem:[%s5008_s7 + $0xd8] sm:$0xf0] }
 0x21b   :  { %v4693_v33 = vpack.c.bf16 %v1150_v28, %v1148_v27  ;;  %v3340_v27 = vld [vmem:[%s5008_s7 + $0x290] sm:$0xf0]  ;;  %v3337_v28 = vld [vmem:[%s5008_s7 + $0x27c] sm:$0xf] }
 0x21c   :  { %v1145_v38 = vpop.f32.mrf.mxu2 }
 0x21d   :  { %v1146_v40 = vadd.f32 %v1145_v38, %v1037_v20  ;;  %1882 = vmatmul.bf16.vlgmr.msra.gmra.mxu1 %v4693_v33  ;;  %1910 = vmatmul.bf16.vlgmr.msrb.gmra.mxu0 %v4693_v33  ;;  %v2754_v20 = vld [vmem:[%s5008_s7 + $0x80] sm:$0xf]  ;;  %v3007_v38 = vor.u32 %v3340_v27, %v3006_v26  ;;  %v3348_v26 = vld [vmem:[%s5008_s7 + $0x2d0] sm:$0xf0]  ;;  %v2791_v27 = vor.u32 %v3285_v23, %v2790_v22 }
 0x21e   :  { %1986 = vmatpush.bf16.msra.mxu1 %v2895_v29  ;;  %2014 = vmatpush.bf16.msrb.mxu0 %v2899_v30  ;;  %v3008_v29 = vld [vmem:[%s5008_s7 + $0x294] sm:$0xf0]  ;;  %v2755_v30 = vor.u32 %v3277_v21, %v2754_v20  ;;  %v3355_v20 = vld [vmem:[%s5008_s7 + $0x308] sm:$0xf0]  ;;  %v2819_v21 = vor.u32 %v3292_v17, %v2818_v16 }
 0x21f   :  { %v1151_v51 = vmax.f32 %v1146_v40, 0.0  ;;  %v3011_v39 = vor.u32 %v3337_v28, %v3008_v29  ;;  %v2978_v40 = vld [vmem:[%s5008_s7 + $0x240] sm:$0xf]  ;;  %v2762_v28 = vld [vmem:[%s5008_s7 + $0x88] sm:$0xf] }
 0x220   :  { %v2979_v52 = vor.u32 %v3333_v41, %v2978_v40  ;;  %v3278_v29 = vld [vmem:[%s5008_s7 + $0xa0] sm:$0xf0] }
 0x221   :  { %v4733_v58 = vpack.c.bf16 %v1151_v51, %v1149_v50  ;;  %v3260_v50 = vld [vmem:[%s5008_s7 + $0x14] sm:$0xf]  ;;  %v2700_v51 = vld [vmem:[%s5008_s7 + $0x2c] sm:$0xf0]  ;;  %v3334_v40 = vld [vmem:[%s5008_s7 + $0x260] sm:$0xf0] }
 0x222   :  { %1987 = vmatpush.bf16.msra.mxu1 %v2867_v45  ;;  %2015 = vmatpush.bf16.msrb.mxu0 %v2871_v46  ;;  %v2727_v45 = vor.u32 %v3270_v34, %v2726_v32  ;;  %v2731_v46 = vor.u32 %v3267_v35, %v2728_v36  ;;  %v3341_v32 = vld [vmem:[%s5008_s7 + $0x298] sm:$0xf0]  ;;  %v2763_v34 = vor.u32 %v3278_v29, %v2762_v28  ;;  %v2734_v35 = vld [vmem:[%s5008_s7 + $0x50] sm:$0xf]  ;;  %v3271_v36 = vld [vmem:[%s5008_s7 + $0x68] sm:$0xf0] }
 0x223   :  { %1896 = vmatmul.bf16.vlgmr.msra.gmra.mxu3 %v4733_v58  ;;  %1924 = vmatmul.bf16.vlgmr.msrb.gmra.mxu2 %v4733_v58  ;;  %v2735_v41 = vor.u32 %v3271_v36, %v2734_v35 }
 0x224   :  { %2000 = vmatpush.bf16.msra.mxu3 %v3119_v55  ;;  %2028 = vmatpush.bf16.msrb.mxu2 %v3123_v56  ;;  %v2902_v55 = vld [vmem:[%s5008_s7 + $0x1a0] sm:$0xf]  ;;  %v3313_v56 = vld [vmem:[%s5008_s7 + $0x1b8] sm:$0xf0] }
 0x225   :  { %v2903_v2 = vor.u32 %v3313_v56, %v2902_v55 }
 0x226   :  { %1988 = vmatpush.bf16.msra.mxu1 %v2839_v0  ;;  %2016 = vmatpush.bf16.msrb.mxu0 %v2843_v1  ;;  %v2699_v0 = vor.u32 %v3263_v49, %v2698_v47  ;;  %v2703_v1 = vor.u32 %v3260_v50, %v2700_v51  ;;  %v3327_v47 = vld [vmem:[%s5008_s7 + $0x228] sm:$0xf0]  ;;  %v2707_v49 = vor.u32 %v3264_v43, %v2706_v42  ;;  %v2930_v51 = vld [vmem:[%s5008_s7 + $0x1d8] sm:$0xf] }
 0x228   :  { %2001 = vmatpush.bf16.msra.mxu3 %v3091_v7  ;;  %2029 = vmatpush.bf16.msrb.mxu2 %v3095_v8  ;;  %v3306_v7 = vld [vmem:[%s5008_s7 + $0x180] sm:$0xf0]  ;;  %v2922_v8 = vld [vmem:[%s5008_s7 + $0x1d0] sm:$0xf] }
 0x229   :  { %v2923_v44 = vor.u32 %v3319_v9, %v2922_v8 }
 0x22a   :  { %1989 = vmatpush.bf16.msra.mxu1 %v2811_v48  ;;  %2017 = vmatpush.bf16.msrb.mxu0 %v2815_v37  ;;  %v3369_v48 = vld [vmem:[%s5008_s7 + $0x378] sm:$0xf0]  ;;  %v2875_v37 = vor.u32 %v3306_v7, %v2874_v6 }
 0x22c   :  { %2002 = vmatpush.bf16.msra.mxu3 %v3063_v12  ;;  %2030 = vmatpush.bf16.msrb.mxu2 %v3067_v13  ;;  %v3127_v12 = vor.u32 %v3369_v48, %v3126_v63  ;;  %v3098_v13 = vld [vmem:[%s5008_s7 + $0x328] sm:$0xf] }
 0x22d   :  { %1938 = vmatmul.bf16.vlgmr.msrb.gmra.mxu1 %v4693_v33  ;;  %1966 = vmatmul.bf16.vlgmr.msra.gmra.mxu0 %v4693_v33 }
 0x22e   :  { %1990 = vmatpush.bf16.msra.mxu1 %v2783_v18  ;;  %2018 = vmatpush.bf16.msrb.mxu0 %v2787_v19  ;;  %v3099_v18 = vor.u32 %v3362_v14, %v3098_v13  ;;  %v3070_v19 = vld [vmem:[%s5008_s7 + $0x2f0] sm:$0xf] }
 0x230   :  { %2003 = vmatpush.bf16.msra.mxu3 %v3035_v24  ;;  %2031 = vmatpush.bf16.msrb.mxu2 %v3039_v25  ;;  %v3071_v24 = vor.u32 %v3355_v20, %v3070_v19  ;;  %v3042_v25 = vld [vmem:[%s5008_s7 + $0x2b8] sm:$0xf] }
 0x232   :  { %1991 = vmatpush.bf16.msra.mxu1 %v2755_v30  ;;  %2019 = vmatpush.bf16.msrb.mxu0 %v2759_v31  ;;  %v3043_v30 = vor.u32 %v3348_v26, %v3042_v25  ;;  %v3014_v31 = vld [vmem:[%s5008_s7 + $0x280] sm:$0xf] }
 0x233   :  { %1952 = vmatmul.bf16.vlgmr.msrb.gmra.mxu3 %v4733_v58  ;;  %1980 = vmatmul.bf16.vlgmr.msra.gmra.mxu2 %v4733_v58 }
 0x234   :  { %2004 = vmatpush.bf16.msra.mxu3 %v3007_v38  ;;  %2032 = vmatpush.bf16.msrb.mxu2 %v3011_v39  ;;  %v3015_v38 = vor.u32 %v3341_v32, %v3014_v31  ;;  %v2986_v39 = vld [vmem:[%s5008_s7 + $0x248] sm:$0xf] }
 0x236   :  { %1992 = vmatpush.bf16.msra.mxu1 %v2727_v45  ;;  %2020 = vmatpush.bf16.msrb.mxu0 %v2731_v46  ;;  %v2987_v45 = vor.u32 %v3334_v40, %v2986_v39  ;;  %v2958_v46 = vld [vmem:[%s5008_s7 + $0x210] sm:$0xf] }
 0x237   :  { %v2959_v50 = vor.u32 %v3327_v47, %v2958_v46  ;;  %v1288_v46 = vperm.slane %v4987_v57, 4 }
 0x238   :  { %2005 = vmatpush.bf16.msra.mxu3 %v2979_v52  ;;  %2033 = vmatpush.bf16.msrb.mxu2 %v2983_v53  ;;  %v3320_v52 = vld [vmem:[%s5008_s7 + $0x1f0] sm:$0xf0]  ;;  %s3428_s7 = smov [#allocation2]  }
 0x239   :  { %v2931_v53 = vor.u32 %v3320_v52, %v2930_v51  ;;  %s2144_s8 = sshll.u32 %s3428_s7, 4  ;;  %s2145_s8 = int_to_ptr.vmem [resolvable:$true] %s2144_s8 }
 0x23a   :  { %1993 = vmatpush.bf16.msra.mxu1 %v2699_v0  ;;  %2021 = vmatpush.bf16.msrb.mxu0 %v2703_v1 }
 0x23c   :  { %2006 = vmatpush.bf16.msra.mxu3 %v2951_v3  ;;  %2034 = vmatpush.bf16.msrb.mxu2 %v2955_v5 }
 0x23d   :  { %1994 = vmatmul.bf16.vlgmr.msra.gmra.mxu1 %v4693_v33  ;;  %2022 = vmatmul.bf16.vlgmr.msrb.gmra.mxu0 %v4693_v33 }
 0x23e   :  { %2042 = vmatpush.bf16.msrb.mxu1 %v2903_v2 }
 0x240   :  { %2007 = vmatpush.bf16.msra.mxu3 %v2923_v44  ;;  %2035 = vmatpush.bf16.msrb.mxu2 %v2927_v10 }
 0x242   :  { %2043 = vmatpush.bf16.msrb.mxu1 %v2875_v37 }
 0x243   :  { %2008 = vmatmul.bf16.vlgmr.msra.gmra.mxu3 %v4733_v58  ;;  %2036 = vmatmul.bf16.vlgmr.msrb.gmra.mxu2 %v4733_v58 }
 0x244   :  { %2056 = vmatpush.bf16.msrb.mxu3 %v3127_v12 }
 0x246   :  { %2044 = vmatpush.bf16.msrb.mxu1 %v2847_v15 }
 0x248   :  { %2057 = vmatpush.bf16.msrb.mxu3 %v3099_v18 }
 0x24a   :  { %2045 = vmatpush.bf16.msrb.mxu1 %v2819_v21 }
 0x24c   :  { %2058 = vmatpush.bf16.msrb.mxu3 %v3071_v24 }
 0x24e   :  { %2046 = vmatpush.bf16.msrb.mxu1 %v2791_v27 }
 0x250   :  { %2059 = vmatpush.bf16.msrb.mxu3 %v3043_v30 }
 0x252   :  { %2047 = vmatpush.bf16.msrb.mxu1 %v2763_v34 }
 0x254   :  { %2060 = vmatpush.bf16.msrb.mxu3 %v3015_v38 }
 0x256   :  { %2048 = vmatpush.bf16.msrb.mxu1 %v2735_v41 }
 0x258   :  { %2061 = vmatpush.bf16.msrb.mxu3 %v2987_v45 }
 0x25a   :  { %2049 = vmatpush.bf16.msrb.mxu1 %v2707_v49 }
 0x25c   :  { %2062 = vmatpush.bf16.msrb.mxu3 %v2959_v50 }
 0x25d   :  { %2050 = vmatmul.bf16.vlgmr.msrb.gmra.mxu1 %v4693_v33 }
 0x260   :  { %2063 = vmatpush.bf16.msrb.mxu3 %v2931_v53  ;;  %v1289_v53 = vperm.slane %v4987_v57, 5 }
 0x263   :  { %2064 = vmatmul.bf16.vlgmr.msrb.gmra.mxu3 %v4733_v58 }
 0x29a   :  { %v1883_v55 = vpop.f32.mrf.mxu1  ;;  %v1911_v56 = vpop.f32.mrf.mxu0 }
 0x29b   :  { %v1884_v1 = vadd.f32 %v1883_v55, %v1284_v59  ;;  %v1912_v2 = vadd.f32 %v1911_v56, %v1285_v61 }
 0x2a2   :  { %v1885_v62 = vpop.f32.mrf.mxu1  ;;  %v1913_v0 = vpop.f32.mrf.mxu0 }
 0x2a3   :  { %v1886_v9 = vadd.f32 %v1885_v62, %v1284_v59  ;;  %v1914_v4 = vadd.f32 %v1913_v0, %v1285_v61 }
 0x2a6   :  { %v1897_v3 = vpop.f32.mrf.mxu3  ;;  %v1925_v33 = vpop.f32.mrf.mxu2 }
 0x2a7   :  { %v1898_v5 = vadd.f32 %v1897_v3, %v1884_v1  ;;  %v1926_v6 = vadd.f32 %v1925_v33, %v1912_v2 }
 0x2a9   :  { %v2070_v58 = vmul.f32 0.5, %v1898_v5  ;;  %v2071_v7 = vmul.f32 0.5, %v1926_v6 }
 0x2aa   :  { %v1939_v8 = vpop.f32.mrf.mxu1  ;;  %v1967_v54 = vpop.f32.mrf.mxu0 }
 0x2ab   :  { %3374 = vtanh.f32 %v2070_v58  ;;  %v1940_v19 = vadd.f32 %v1939_v8, %v1286_v11  ;;  %v1968_v20 = vadd.f32 %v1967_v54, %v1287_v60 }
 0x2ac   :  { %3376 = vtanh.f32 %v2071_v7 }
 0x2ae   :  { %v1899_v63 = vpop.f32.mrf.mxu3  ;;  %v1927_v48 = vpop.f32.mrf.mxu2 }
 0x2af   :  { %v1900_v37 = vadd.f32 %v1899_v63, %v1886_v9  ;;  %v1928_v44 = vadd.f32 %v1927_v48, %v1914_v4 }
 0x2b1   :  { %v3375_v10 = vpop.eup %3374  ;;  %v2077_v12 = vmul.f32 0.5, %v1900_v37  ;;  %v2078_v13 = vmul.f32 0.5, %v1928_v44 }
 0x2b2   :  { %v3377_v14 = vpop.eup %3376  ;;  %v2098_v15 = vadd.f32 1.0, %v3375_v10  ;;  %v1941_v21 = vpop.f32.mrf.mxu1 }
 0x2b3   :  { %v2099_v16 = vadd.f32 1.0, %v3377_v14  ;;  %3378 = vtanh.f32 %v2077_v12  ;;  %v1969_v24 = vpop.f32.mrf.mxu0  ;;  %v1942_v36 = vadd.f32 %v1941_v21, %v1286_v11 }
 0x2b4   :  { %v2112_v17 = vmul.f32 0.5, %v2098_v15  ;;  %3380 = vtanh.f32 %v2078_v13  ;;  %v1970_v38 = vadd.f32 %v1969_v24, %v1287_v60 }
 0x2b5   :  { %v2113_v18 = vmul.f32 0.5, %v2099_v16 }
 0x2b6   :  { %2126 = vst [vmem:[#allocation2] sm:$0xff] %v2112_v17  ;;  %v1953_v22 = vpop.f32.mrf.mxu3  ;;  %v1981_v23 = vpop.f32.mrf.mxu2 }
 0x2b7   :  { %2127 = vst [vmem:[#allocation2 + $0x8] sm:$0xff] %v2113_v18  ;;  %v1954_v25 = vadd.f32 %v1953_v22, %v1940_v19  ;;  %v1982_v26 = vadd.f32 %v1981_v23, %v1968_v20 }
 0x2b9   :  { %v3379_v27 = vpop.eup %3378  ;;  %v2072_v28 = vmul.f32 0.5, %v1954_v25  ;;  %v2073_v29 = vmul.f32 0.5, %v1982_v26 }
 0x2ba   :  { %v3381_v30 = vpop.eup %3380  ;;  %v2105_v31 = vadd.f32 1.0, %v3379_v27  ;;  %v1995_v43 = vpop.f32.mrf.mxu1  ;;  %v1290_v27 = vperm.slane %v4987_v57, 6 }
 0x2bb   :  { %v2106_v32 = vadd.f32 1.0, %v3381_v30  ;;  %3382 = vtanh.f32 %v2072_v28  ;;  %v2023_v47 = vpop.f32.mrf.mxu0  ;;  %v1996_v61 = vadd.f32 %v1995_v43, %v1288_v46 }
 0x2bc   :  { %v2119_v34 = vmul.f32 0.5, %v2105_v31  ;;  %3384 = vtanh.f32 %v2073_v29  ;;  %v2024_v62 = vadd.f32 %v2023_v47, %v1289_v53 }
 0x2bd   :  { %v2120_v35 = vmul.f32 0.5, %v2106_v32 }
 0x2be   :  { %2133 = vst [vmem:[#allocation2 + $0x38] sm:$0xff] %v2119_v34  ;;  %v1955_v39 = vpop.f32.mrf.mxu3  ;;  %v1983_v40 = vpop.f32.mrf.mxu2 }
 0x2bf   :  { %2134 = vst [vmem:[#allocation2 + $0x40] sm:$0xff] %v2120_v35  ;;  %v1956_v41 = vadd.f32 %v1955_v39, %v1942_v36  ;;  %v1984_v42 = vadd.f32 %v1983_v40, %v1970_v38 }
 0x2c1   :  { %v3383_v45 = vpop.eup %3382  ;;  %v2079_v49 = vmul.f32 0.5, %v1956_v41  ;;  %v2080_v50 = vmul.f32 0.5, %v1984_v42 }
 0x2c2   :  { %v3385_v51 = vpop.eup %3384  ;;  %v2100_v52 = vadd.f32 1.0, %v3383_v45  ;;  %v1997_v7 = vpop.f32.mrf.mxu1 }
 0x2c3   :  { %v2101_v55 = vadd.f32 1.0, %v3385_v51  ;;  %3386 = vtanh.f32 %v2079_v49  ;;  %v2025_v4 = vpop.f32.mrf.mxu0  ;;  %v1998_v48 = vadd.f32 %v1997_v7, %v1288_v46 }
 0x2c4   :  { %v2114_v56 = vmul.f32 0.5, %v2100_v52  ;;  %3388 = vtanh.f32 %v2080_v50  ;;  %v2026_v37 = vadd.f32 %v2025_v4, %v1289_v53 }
 0x2c5   :  { %v2115_v59 = vmul.f32 0.5, %v2101_v55 }
 0x2c6   :  { %2128 = vst [vmem:[#allocation2 + $0x10] sm:$0xff] %v2114_v56  ;;  %v2009_v0 = vpop.f32.mrf.mxu3  ;;  %v2037_v2 = vpop.f32.mrf.mxu2 }
 0x2c7   :  { %2129 = vst [vmem:[#allocation2 + $0x18] sm:$0xff] %v2115_v59  ;;  %v2010_v1 = vadd.f32 %v2009_v0, %v1996_v61  ;;  %v2038_v3 = vadd.f32 %v2037_v2, %v2024_v62 }
 0x2c9   :  { %v3387_v33 = vpop.eup %3386  ;;  %v2074_v5 = vmul.f32 0.5, %v2010_v1  ;;  %v2075_v8 = vmul.f32 0.5, %v2038_v3 }
 0x2ca   :  { %v3389_v6 = vpop.eup %3388  ;;  %v2107_v58 = vadd.f32 1.0, %v3387_v33 }
 0x2cb   :  { %v2108_v9 = vadd.f32 1.0, %v3389_v6  ;;  %3390 = vtanh.f32 %v2074_v5 }
 0x2cc   :  { %v2121_v54 = vmul.f32 0.5, %v2107_v58  ;;  %3392 = vtanh.f32 %v2075_v8 }
 0x2cd   :  { %v2122_v63 = vmul.f32 0.5, %v2108_v9 }
 0x2ce   :  { %2135 = vst [vmem:[#allocation2 + $0x48] sm:$0xff] %v2121_v54  ;;  %v2011_v44 = vpop.f32.mrf.mxu3  ;;  %v2039_v11 = vpop.f32.mrf.mxu2 }
 0x2cf   :  { %2136 = vst [vmem:[#allocation2 + $0x50] sm:$0xff] %v2122_v63  ;;  %v2012_v10 = vadd.f32 %v2011_v44, %v1998_v48  ;;  %v2040_v60 = vadd.f32 %v2039_v11, %v2026_v37 }
 0x2d1   :  { %v3391_v12 = vpop.eup %3390  ;;  %v2081_v13 = vmul.f32 0.5, %v2012_v10  ;;  %v2082_v16 = vmul.f32 0.5, %v2040_v60 }
 0x2d2   :  { %v3393_v14 = vpop.eup %3392  ;;  %v2102_v15 = vadd.f32 1.0, %v3391_v12 }
 0x2d3   :  { %v2103_v17 = vadd.f32 1.0, %v3393_v14  ;;  %3394 = vtanh.f32 %v2081_v13 }
 0x2d4   :  { %v2116_v18 = vmul.f32 0.5, %v2102_v15  ;;  %3396 = vtanh.f32 %v2082_v16 }
 0x2d5   :  { %v2117_v19 = vmul.f32 0.5, %v2103_v17 }
 0x2d6   :  { %2130 = vst [vmem:[#allocation2 + $0x20] sm:$0xff] %v2116_v18 }
 0x2d7   :  { %2131 = vst [vmem:[#allocation2 + $0x28] sm:$0xff] %v2117_v19 }
 0x2d9   :  { %v3395_v20 = vpop.eup %3394 }
 0x2da   :  { %v3397_v21 = vpop.eup %3396  ;;  %v2109_v22 = vadd.f32 1.0, %v3395_v20  ;;  %v2051_v26 = vpop.f32.mrf.mxu1 }
 0x2db   :  { %v2110_v23 = vadd.f32 1.0, %v3397_v21  ;;  %v2052_v28 = vadd.f32 %v2051_v26, %v1290_v27 }
 0x2dc   :  { %v2123_v24 = vmul.f32 0.5, %v2109_v22 }
 0x2dd   :  { %v2124_v25 = vmul.f32 0.5, %v2110_v23 }
 0x2de   :  { %2137 = vst [vmem:[#allocation2 + $0x58] sm:$0xff] %v2123_v24 }
 0x2df   :  { %2138 = vst [vmem:[#allocation2 + $0x60] sm:$0xff] %v2124_v25 }
 0x2e2   :  { %v2053_v32 = vpop.f32.mrf.mxu1 }
 0x2e3   :  { %v2054_v34 = vadd.f32 %v2053_v32, %v1290_v27 }
 0x2e6   :  { %v2065_v29 = vpop.f32.mrf.mxu3 }
 0x2e7   :  { %v2066_v30 = vadd.f32 %v2065_v29, %v2052_v28 }
 0x2e9   :  { %v2076_v31 = vmul.f32 0.5, %v2066_v30 }
 0x2eb   :  { %3398 = vtanh.f32 %v2076_v31 }
 0x2ee   :  { %v2067_v35 = vpop.f32.mrf.mxu3 }
 0x2ef   :  { %v2068_v36 = vadd.f32 %v2067_v35, %v2054_v34 }
 0x2f1   :  { %v3399_v38 = vpop.eup %3398  ;;  %v2083_v39 = vmul.f32 0.5, %v2068_v36 }
 0x2f2   :  { %v2104_v40 = vadd.f32 1.0, %v3399_v38 }
 0x2f3   :  { %3400 = vtanh.f32 %v2083_v39 }
 0x2f4   :  { %v2118_v41 = vmul.f32 0.5, %v2104_v40 }
 0x2f6   :  { %2132 = vst.msk [vmem:[#allocation2 + $0x30] sm:$0xff] %vm649_vm0, %v2118_v41 }
 0x2f9   :  { %v3401_v57 = vpop.eup %3400 }
 0x2fa   :  { %v2111_v42 = vadd.f32 1.0, %v3401_v57 }
 0x2fc   :  { %v2125_v43 = vmul.f32 0.5, %v2111_v42 }
 0x2fe   :  { %2139 = vst.msk [vmem:[#allocation2 + $0x68] sm:$0xff] %vm649_vm0, %v2125_v43 }
 0x2ff   :  { %2152 = dma.vmem_to_hbm [thread:$0]  %s2145_s8, 1792, %s2147_s18, [#allocation3], %s3429_s19, %s3429_s19, %s3430_s20  }
 0x300   :  { %3426 = dma.done.wait [#allocation3], 1792  }
 0x301   :  { %3427 = vsyncadd [#allocation3], 4294965504 }
 0x302   :  { %2157 = vsyncpa [#allocation3], 1 }

</bundles_post_ra>
